<compile_context>
chip_gen: v5e
topology: v5e:2x2
jax: 0.10.0
libtpu: 0.0.40
codegen_flags: <defaults>
</compile_context>

<pallas_src>
import functools

import jax
import jax.numpy as jnp
from jax.experimental import pallas as pl
from jax.experimental.pallas import tpu as pltpu

LANE = 128


def gcn_forward_kernel(x0_ref, a_ref, pool_ref, gw_ref, gb_ref, w1_ref, b1_ref,
                       w2_ref, b2_ref, out_ref, *, num_layers):
    """G graphs per grid step; everything resident in VMEM.

    x0_ref:   [GN, Hp]    packed node features (lane-padded, compute dtype = bf16)
    a_ref:    [GN, GN]    block-diagonal normalized adjacency A_hat
    pool_ref: [G, GN]     per-graph column sums of A_hat placed at the graph's block
    gw_ref:   [L, Hp, Hp] GraphConv weights ([in, out] layout)
    gb_ref:   [L, 1, Hp]  GraphConv biases (f32); last entry pre-scaled by N
    w1_ref:   [Hp, Hp]    linear_1 weight ([in, out]); b1_ref: [1, Hp] (f32)
    w2_ref:   [1, Hp]     linear_2 weight as a lane row (f32)
    b2_ref:   [1, 1]      (f32)
    out_ref:  [G, 1]      (f32)  one scalar per packed graph
    """
    cdtype = x0_ref.dtype
    x = x0_ref[...]                     # [GN, Hp]
    a = a_ref[...]                      # [GN, GN] (block-diagonal)

    # Layers 0 .. L-2:  x <- relu(A_hat @ x @ W_l + b_l)   (dropout is identity in eval)
    for l in range(num_layers - 1):     # static unroll, L is small
        h = jnp.dot(a, x, preferred_element_type=jnp.float32)                 # [GN, Hp]
        h = jnp.dot(h.astype(cdtype), gw_ref[l],
                    preferred_element_type=jnp.float32) + gb_ref[l]
        x = jnp.maximum(h, 0.0).astype(cdtype)

    # Last layer fused with SumPooling (exact — no ReLU after the last GraphConv):
    #   pooled_g = ((1^T A_hat_g) @ x_g) @ W_L + N*b_L   (N*b_L pre-baked into gb_ref[L-1])
    s = jnp.dot(pool_ref[...], x, preferred_element_type=jnp.float32)         # [G, Hp]
    pooled = jnp.dot(s.astype(cdtype), gw_ref[num_layers - 1],
                     preferred_element_type=jnp.float32) + gb_ref[num_layers - 1]

    # MLP head (f32 elementwise).
    y = jnp.dot(pooled.astype(cdtype), w1_ref[...],
                preferred_element_type=jnp.float32) + b1_ref[...]              # [G, Hp]
    y = jnp.maximum(y, 0.0)
    # TODO(synk): the second F.dropout in the PyTorch forward discards its result -> no-op.
    # linear_2 done as VPU multiply + lane reduction (avoids a 1-column MXU result).
    out_ref[...] = jnp.sum(y * w2_ref[...], axis=-1, keepdims=True) + b2_ref[...]


def gcn_forward(x0, adj, nsrc, ndst, gw, gb, w1, b1, w2, b2, *,
                num_layers, graphs_per_block=16, compute_dtype=jnp.bfloat16):
    """Batched GCN forward.

    x0:   [B, N, H]  embedded node features (f32)
    adj:  [B, N, N]  dense adjacency, adj[b, dst, src] = 1.0 for edge src -> dst
    nsrc: [B, N]     out_degree.clamp(1) ** -0.5 ; ndst: [B, N] in_degree.clamp(1) ** -0.5
    gw:   [L, H, H] ; gb: [L, 1, H] ; w1: [H, H] ; b1: [1, H] ; w2: [H, 1] ; b2: [1, 1]
    returns [B, 1] (one scalar per graph).
    graphs_per_block (G): graphs packed per grid step; choose so G*N ~ 128 (v5e) / 256 (v6e/v7x).
    """
    B, N, H = x0.shape
    L = num_layers
    G = graphs_per_block
    assert B % G == 0, (B, G)
    BG = B // G
    GN = G * N
    Hp = max(LANE, ((H + LANE - 1) // LANE) * LANE)

    # Fold the symmetric degree normalization into the adjacency ONCE (per graph, f32).
    a_hat = ndst[:, :, None] * adj * nsrc[:, None, :]                          # [B, N, N]

    # Block-diagonal packed adjacency: a_bd[b, g*N+i, h*N+j] = a_hat_g[i, j] iff g == h.
    eye_g = jnp.eye(G, dtype=a_hat.dtype)
    a4 = a_hat.reshape(BG, G, N, N)
    a_bd = jnp.einsum('bgij,gh->bgihj', a4, eye_g).reshape(BG, GN, GN)
    a_bd = a_bd.astype(compute_dtype)

    # Pooling matrix: row g holds colsum(A_hat_g) in graph g's block, zeros elsewhere.
    colsum = jnp.sum(a_hat, axis=1)                                            # [B, N] (f32)
    pool = jnp.einsum('bgj,gh->bghj', colsum.reshape(BG, G, N),
                      eye_g).reshape(BG, G, GN).astype(compute_dtype)

    # Lane-dense feature axis: zero-pad H -> Hp (exact: zero cols/rows contribute 0).
    def pad_last(arr, target):
        pad = [(0, 0)] * (arr.ndim - 1) + [(0, target - arr.shape[-1])]
        return jnp.pad(arr, pad)

    x0_p = pad_last(x0, Hp).astype(compute_dtype).reshape(BG, GN, Hp)          # packed nodes
    gw_p = jnp.pad(gw, ((0, 0), (0, Hp - H), (0, Hp - H))).astype(compute_dtype)
    # Pre-bake the SumPooling bias scale into the last GraphConv bias (pool over N real nodes).
    gb_adj = gb.at[L - 1].set(gb[L - 1] * float(N))
    gb_p = pad_last(gb_adj, Hp).astype(jnp.float32)                            # [L, 1, Hp]
    w1_p = jnp.pad(w1, ((0, Hp - H), (0, Hp - H))).astype(compute_dtype)
    b1_p = pad_last(b1, Hp).astype(jnp.float32)                                # [1, Hp]
    w2_row = pad_last(w2.T, Hp).astype(jnp.float32)                            # [1, Hp]
    b2_p = b2.astype(jnp.float32)                                              # [1, 1]

    kernel = functools.partial(gcn_forward_kernel, num_layers=L)
    out = pl.pallas_call(
        kernel,
        out_shape=jax.ShapeDtypeStruct((BG, G, 1), jnp.float32),
        grid_spec=pltpu.PrefetchScalarGridSpec(
            num_scalar_prefetch=0,
            grid=(BG,),                                            # G graphs per step
            in_specs=[
                pl.BlockSpec((None, GN, Hp), lambda g: (g, 0, 0)),  # packed node features
                pl.BlockSpec((None, GN, GN), lambda g: (g, 0, 0)),  # block-diagonal A_hat
                pl.BlockSpec((None, G, GN), lambda g: (g, 0, 0)),   # pooling rows
                pl.BlockSpec((L, Hp, Hp), lambda g: (0, 0, 0)),     # gw (shared)
                pl.BlockSpec((L, 1, Hp), lambda g: (0, 0, 0)),      # gb (shared)
                pl.BlockSpec((Hp, Hp), lambda g: (0, 0)),           # w1
                pl.BlockSpec((1, Hp), lambda g: (0, 0)),            # b1
                pl.BlockSpec((1, Hp), lambda g: (0, 0)),            # w2 row
                pl.BlockSpec((1, 1), lambda g: (0, 0)),             # b2
            ],
            out_specs=pl.BlockSpec((None, G, 1), lambda g: (g, 0, 0)),
        ),
        compiler_params=pltpu.CompilerParams(
            dimension_semantics=("parallel",)),                     # 2x on v7x (2 TCs)
    )(x0_p, a_bd, pool, gw_p, gb_p, w1_p, b1_p, w2_row, b2_p)
    return out.reshape(B, 1)


def reference_forward(x0, adj, nsrc, ndst, gw, gb, w1, b1, w2, b2, *, num_layers):
    """Pure-JAX f32 reference with the original (unfused, unpadded, unpacked) op order."""
    hp = jax.lax.Precision.HIGHEST

    def one_graph(x, a, ns, nd):
        for l in range(num_layers):
            h = x * ns[:, None]                    # D_out^{-1/2} * x
            h = jnp.dot(a, h, precision=hp)        # aggregate over in-edges
            h = h * nd[:, None]                    # D_in^{-1/2}
            h = jnp.dot(h, gw[l], precision=hp) + gb[l]
            if l < num_layers - 1:
                h = jnp.maximum(h, 0.0)
            x = h
        pooled = jnp.sum(x, axis=0, keepdims=True)
        y = jnp.maximum(jnp.dot(pooled, w1, precision=hp) + b1, 0.0)
        return jnp.dot(y, w2, precision=hp) + b2   # [1, 1]

    outs = jax.vmap(one_graph)(x0, adj, nsrc, ndst)   # [B, 1, 1]
    return outs[:, 0, :]


if __name__ == "__main__":
    # Small, deterministic problem: a batch of B tiny graphs.
    B = 32            # total graphs
    G = 16            # graphs packed per grid step  -> M = G*N = 256 MXU rows, grid = 2
    N = 16            # nodes per graph
    H = 32            # hidden_units (lane-padded to 128 inside the wrapper)
    L = 3             # num_layers
    MAX_Z = 1000      # node-labeling vocab

    key = jax.random.PRNGKey(0)
    keys = jax.random.split(key, 10)

    # --- inputs -------------------------------------------------------------
    z = jax.random.randint(keys[0], (B, N), 0, MAX_Z)                 # node labels
    adj_mask = jax.random.bernoulli(keys[1], 0.3, (B, N, N))          # A[b, dst, src]
    adj_mask = adj_mask & (~jnp.eye(N, dtype=bool))[None]             # no self loops
    A = adj_mask.astype(jnp.float32)

    in_deg = jnp.sum(A, axis=2)                                       # edges into dst
    out_deg = jnp.sum(A, axis=1)                                      # edges out of src
    nsrc = jnp.maximum(out_deg, 1.0) ** -0.5                          # [B, N]
    ndst = jnp.maximum(in_deg, 1.0) ** -0.5                           # [B, N]

    # --- parameters (deterministic synthetic init) --------------------------
    z_emb_table = jax.random.normal(keys[2], (MAX_Z, H), jnp.float32) # nn.Embedding(max_z, H)
    gw = 0.1 * jax.random.normal(keys[3], (L, H, H), jnp.float32)     # GraphConv W [in, out]
    gb = 0.1 * jax.random.normal(keys[4], (L, 1, H), jnp.float32)     # GraphConv b
    w1 = 0.1 * jax.random.normal(keys[5], (H, H), jnp.float32)        # linear_1 W^T [in, out]
    b1 = 0.1 * jax.random.normal(keys[6], (1, H), jnp.float32)
    w2 = 0.1 * jax.random.normal(keys[7], (H, 1), jnp.float32)        # linear_2 W^T [in, 1]
    b2 = 0.1 * jax.random.normal(keys[8], (1, 1), jnp.float32)

    # Embedding lookup is glue (gather), done in plain JAX.
    x0 = jnp.take(z_emb_table, z.reshape(-1), axis=0).reshape(B, N, H)

    out = gcn_forward(x0, A, nsrc, ndst, gw, gb, w1, b1, w2, b2,
                      num_layers=L, graphs_per_block=G,
                      compute_dtype=jnp.bfloat16)
    out = jax.block_until_ready(out)

    ref = reference_forward(x0, A, nsrc, ndst, gw, gb, w1, b1, w2, b2, num_layers=L)
    assert out.shape == (B, 1), out.shape
    assert jnp.allclose(out, ref, rtol=2e-2, atol=2e-2), (out, ref)

    print("KERNEL_OK")
</pallas_src>

<mosaic_0001>
module attributes {stable_mosaic.version = 11 : i64} {
  func.func @gcn_forward_kernel(%arg0: i32, %arg1: memref<1x256x128xbf16, #tpu.memory_space<vmem>>, %arg2: memref<1x256x256xbf16, #tpu.memory_space<vmem>>, %arg3: memref<1x16x256xbf16, #tpu.memory_space<vmem>>, %arg4: memref<3x128x128xbf16, #tpu.memory_space<vmem>>, %arg5: memref<3x1x128xf32, #tpu.memory_space<vmem>>, %arg6: memref<128x128xbf16, #tpu.memory_space<vmem>>, %arg7: memref<1x128xf32, #tpu.memory_space<vmem>>, %arg8: memref<1x128xf32, #tpu.memory_space<vmem>>, %arg9: memref<1x1xf32, #tpu.memory_space<vmem>>, %arg10: memref<1x16x1xf32, #tpu.memory_space<vmem>>) attributes {dimension_semantics = [#tpu.dimension_semantics<parallel>], iteration_bounds = array<i64: 2>, scalar_prefetch = 0 : i64, scratch_operands = 0 : i64, tpu.core_type = #tpu.core_type<tc>, window_params = [{transform_indices = @transform_0, window_bounds = array<i64: 1, 256, 128>}, {transform_indices = @transform_1, window_bounds = array<i64: 1, 256, 256>}, {transform_indices = @transform_2, window_bounds = array<i64: 1, 16, 256>}, {pipeline_mode = #tpu.pipeline_mode<synchronous>, transform_indices = @transform_3, window_bounds = array<i64: 3, 128, 128>}, {pipeline_mode = #tpu.pipeline_mode<synchronous>, transform_indices = @transform_4, window_bounds = array<i64: 3, 1, 128>}, {pipeline_mode = #tpu.pipeline_mode<synchronous>, transform_indices = @transform_5, window_bounds = array<i64: 128, 128>}, {pipeline_mode = #tpu.pipeline_mode<synchronous>, transform_indices = @transform_6, window_bounds = array<i64: 1, 128>}, {pipeline_mode = #tpu.pipeline_mode<synchronous>, transform_indices = @transform_7, window_bounds = array<i64: 1, 128>}, {pipeline_mode = #tpu.pipeline_mode<synchronous>, transform_indices = @transform_8, window_bounds = array<i64: 1, 1>}, {transform_indices = @transform_9, window_bounds = array<i64: 1, 16, 1>}]} {
    %c0 = arith.constant 0 : index
    %c0_0 = arith.constant 0 : index
    %c0_1 = arith.constant 0 : index
    %0 = vector.load %arg1[%c0, %c0_0, %c0_1] : memref<1x256x128xbf16, #tpu.memory_space<vmem>>, vector<1x256x128xbf16>
    %1 = vector.shape_cast %0 : vector<1x256x128xbf16> to vector<256x128xbf16>
    %c0_2 = arith.constant 0 : index
    %c0_3 = arith.constant 0 : index
    %c0_4 = arith.constant 0 : index
    %2 = vector.load %arg2[%c0_2, %c0_3, %c0_4] : memref<1x256x256xbf16, #tpu.memory_space<vmem>>, vector<1x256x256xbf16>
    %3 = vector.shape_cast %2 : vector<1x256x256xbf16> to vector<256x256xbf16>
    %cst = arith.constant dense<0.000000e+00> : vector<256x128xf32>
    %4 = tpu.matmul %3, %1, %cst {dimension_numbers = #tpu.dot_dimension_numbers<[1], [0], [0], [1], [0, 0, 1, 1], [], []>} : vector<256x256xbf16>, vector<256x128xbf16>, vector<256x128xf32> -> vector<256x128xf32>
    %5 = arith.truncf %4 : vector<256x128xf32> to vector<256x128xbf16>
    %c0_5 = arith.constant 0 : index
    %c0_6 = arith.constant 0 : index
    %c0_7 = arith.constant 0 : index
    %6 = vector.load %arg4[%c0_5, %c0_6, %c0_7] : memref<3x128x128xbf16, #tpu.memory_space<vmem>>, vector<1x128x128xbf16>
    %7 = vector.shape_cast %6 : vector<1x128x128xbf16> to vector<128x128xbf16>
    %cst_8 = arith.constant dense<0.000000e+00> : vector<256x128xf32>
    %8 = tpu.matmul %5, %7, %cst_8 {dimension_numbers = #tpu.dot_dimension_numbers<[1], [0], [0], [1], [0, 0, 1, 1], [], []>} : vector<256x128xbf16>, vector<128x128xbf16>, vector<256x128xf32> -> vector<256x128xf32>
    %c0_9 = arith.constant 0 : index
    %c0_10 = arith.constant 0 : index
    %c0_11 = arith.constant 0 : index
    %9 = vector.load %arg5[%c0_9, %c0_10, %c0_11] : memref<3x1x128xf32, #tpu.memory_space<vmem>>, vector<1x1x128xf32>
    %10 = vector.shape_cast %9 : vector<1x1x128xf32> to vector<1x128xf32>
    %11 = vector.broadcast %10 : vector<1x128xf32> to vector<256x128xf32>
    %12 = arith.addf %8, %11 : vector<256x128xf32>
    %cst_12 = arith.constant 0.000000e+00 : f32
    %13 = vector.broadcast %cst_12 : f32 to vector<256x128xf32>
    %14 = arith.maximumf %12, %13 : vector<256x128xf32>
    %15 = arith.truncf %14 : vector<256x128xf32> to vector<256x128xbf16>
    %cst_13 = arith.constant dense<0.000000e+00> : vector<256x128xf32>
    %16 = tpu.matmul %3, %15, %cst_13 {dimension_numbers = #tpu.dot_dimension_numbers<[1], [0], [0], [1], [0, 0, 1, 1], [], []>} : vector<256x256xbf16>, vector<256x128xbf16>, vector<256x128xf32> -> vector<256x128xf32>
    %17 = arith.truncf %16 : vector<256x128xf32> to vector<256x128xbf16>
    %c1 = arith.constant 1 : index
    %c0_14 = arith.constant 0 : index
    %c0_15 = arith.constant 0 : index
    %18 = vector.load %arg4[%c1, %c0_14, %c0_15] : memref<3x128x128xbf16, #tpu.memory_space<vmem>>, vector<1x128x128xbf16>
    %19 = vector.shape_cast %18 : vector<1x128x128xbf16> to vector<128x128xbf16>
    %cst_16 = arith.constant dense<0.000000e+00> : vector<256x128xf32>
    %20 = tpu.matmul %17, %19, %cst_16 {dimension_numbers = #tpu.dot_dimension_numbers<[1], [0], [0], [1], [0, 0, 1, 1], [], []>} : vector<256x128xbf16>, vector<128x128xbf16>, vector<256x128xf32> -> vector<256x128xf32>
    %c1_17 = arith.constant 1 : index
    %c0_18 = arith.constant 0 : index
    %c0_19 = arith.constant 0 : index
    %21 = vector.load %arg5[%c1_17, %c0_18, %c0_19] : memref<3x1x128xf32, #tpu.memory_space<vmem>>, vector<1x1x128xf32>
    %22 = vector.shape_cast %21 : vector<1x1x128xf32> to vector<1x128xf32>
    %23 = vector.broadcast %22 : vector<1x128xf32> to vector<256x128xf32>
    %24 = arith.addf %20, %23 : vector<256x128xf32>
    %cst_20 = arith.constant 0.000000e+00 : f32
    %25 = vector.broadcast %cst_20 : f32 to vector<256x128xf32>
    %26 = arith.maximumf %24, %25 : vector<256x128xf32>
    %27 = arith.truncf %26 : vector<256x128xf32> to vector<256x128xbf16>
    %c0_21 = arith.constant 0 : index
    %c0_22 = arith.constant 0 : index
    %c0_23 = arith.constant 0 : index
    %28 = vector.load %arg3[%c0_21, %c0_22, %c0_23] : memref<1x16x256xbf16, #tpu.memory_space<vmem>>, vector<1x16x256xbf16>
    %29 = vector.shape_cast %28 : vector<1x16x256xbf16> to vector<16x256xbf16>
    %cst_24 = arith.constant dense<0.000000e+00> : vector<16x128xf32>
    %30 = tpu.matmul %29, %27, %cst_24 {dimension_numbers = #tpu.dot_dimension_numbers<[1], [0], [0], [1], [0, 0, 1, 1], [], []>} : vector<16x256xbf16>, vector<256x128xbf16>, vector<16x128xf32> -> vector<16x128xf32>
    %31 = arith.truncf %30 : vector<16x128xf32> to vector<16x128xbf16>
    %c2 = arith.constant 2 : index
    %c0_25 = arith.constant 0 : index
    %c0_26 = arith.constant 0 : index
    %32 = vector.load %arg4[%c2, %c0_25, %c0_26] : memref<3x128x128xbf16, #tpu.memory_space<vmem>>, vector<1x128x128xbf16>
    %33 = vector.shape_cast %32 : vector<1x128x128xbf16> to vector<128x128xbf16>
    %cst_27 = arith.constant dense<0.000000e+00> : vector<16x128xf32>
    %34 = tpu.matmul %31, %33, %cst_27 {dimension_numbers = #tpu.dot_dimension_numbers<[1], [0], [0], [1], [0, 0, 1, 1], [], []>} : vector<16x128xbf16>, vector<128x128xbf16>, vector<16x128xf32> -> vector<16x128xf32>
    %c2_28 = arith.constant 2 : index
    %c0_29 = arith.constant 0 : index
    %c0_30 = arith.constant 0 : index
    %35 = vector.load %arg5[%c2_28, %c0_29, %c0_30] : memref<3x1x128xf32, #tpu.memory_space<vmem>>, vector<1x1x128xf32>
    %36 = vector.shape_cast %35 : vector<1x1x128xf32> to vector<1x128xf32>
    %37 = vector.broadcast %36 : vector<1x128xf32> to vector<16x128xf32>
    %38 = arith.addf %34, %37 : vector<16x128xf32>
    %39 = arith.truncf %38 : vector<16x128xf32> to vector<16x128xbf16>
    %c0_31 = arith.constant 0 : index
    %c0_32 = arith.constant 0 : index
    %40 = vector.load %arg6[%c0_31, %c0_32] : memref<128x128xbf16, #tpu.memory_space<vmem>>, vector<128x128xbf16>
    %cst_33 = arith.constant dense<0.000000e+00> : vector<16x128xf32>
    %41 = tpu.matmul %39, %40, %cst_33 {dimension_numbers = #tpu.dot_dimension_numbers<[1], [0], [0], [1], [0, 0, 1, 1], [], []>} : vector<16x128xbf16>, vector<128x128xbf16>, vector<16x128xf32> -> vector<16x128xf32>
    %c0_34 = arith.constant 0 : index
    %c0_35 = arith.constant 0 : index
    %42 = vector.load %arg7[%c0_34, %c0_35] : memref<1x128xf32, #tpu.memory_space<vmem>>, vector<1x128xf32>
    %43 = vector.broadcast %42 : vector<1x128xf32> to vector<16x128xf32>
    %44 = arith.addf %41, %43 : vector<16x128xf32>
    %cst_36 = arith.constant 0.000000e+00 : f32
    %45 = vector.broadcast %cst_36 : f32 to vector<16x128xf32>
    %46 = arith.maximumf %44, %45 : vector<16x128xf32>
    %c0_37 = arith.constant 0 : index
    %c0_38 = arith.constant 0 : index
    %47 = vector.load %arg8[%c0_37, %c0_38] : memref<1x128xf32, #tpu.memory_space<vmem>>, vector<1x128xf32>
    %48 = vector.broadcast %47 : vector<1x128xf32> to vector<16x128xf32>
    %49 = arith.mulf %46, %48 : vector<16x128xf32>
    %cst_39 = arith.constant dense<0.000000e+00> : vector<16xf32>
    %50 = vector.multi_reduction <add>, %49, %cst_39 [1] : vector<16x128xf32> to vector<16xf32>
    %51 = vector.shape_cast %50 : vector<16xf32> to vector<16x1xf32>
    %c0_40 = arith.constant 0 : index
    %c0_41 = arith.constant 0 : index
    %52 = vector.load %arg9[%c0_40, %c0_41] : memref<1x1xf32, #tpu.memory_space<vmem>>, vector<1x1xf32>
    %53 = vector.broadcast %52 : vector<1x1xf32> to vector<16x1xf32>
    %54 = arith.addf %51, %53 : vector<16x1xf32>
    %c0_42 = arith.constant 0 : index
    %c0_43 = arith.constant 0 : index
    %c0_44 = arith.constant 0 : index
    %55 = vector.load %arg10[%c0_42, %c0_43, %c0_44] : memref<1x16x1xf32, #tpu.memory_space<vmem>>, vector<1x16x1xf32>
    %56 = vector.shape_cast %55 : vector<1x16x1xf32> to vector<16x1xf32>
    %57 = vector.shape_cast %54 : vector<16x1xf32> to vector<1x16x1xf32>
    tpu.vector_store %arg10[%c0_42, %c0_43, %c0_44], %57 {strides = array<i32>} : memref<1x16x1xf32, #tpu.memory_space<vmem>>, vector<1x16x1xf32>,
    return
  }
  func.func @transform_0(%arg0: i32) -> (i32, i32, i32) {
    %c0_i32 = arith.constant 0 : i32
    %c0_i32_0 = arith.constant 0 : i32
    %c0_i32_1 = arith.constant 0 : i32
    return %arg0, %c0_i32, %c0_i32_0 : i32, i32, i32
  }
  func.func @transform_1(%arg0: i32) -> (i32, i32, i32) {
    %c0_i32 = arith.constant 0 : i32
    %c0_i32_0 = arith.constant 0 : i32
    %c0_i32_1 = arith.constant 0 : i32
    return %arg0, %c0_i32, %c0_i32_0 : i32, i32, i32
  }
  func.func @transform_2(%arg0: i32) -> (i32, i32, i32) {
    %c0_i32 = arith.constant 0 : i32
    %c0_i32_0 = arith.constant 0 : i32
    %c0_i32_1 = arith.constant 0 : i32
    return %arg0, %c0_i32, %c0_i32_0 : i32, i32, i32
  }
  func.func @transform_3(%arg0: i32) -> (i32, i32, i32) {
    %c0_i32 = arith.constant 0 : i32
    %c0_i32_0 = arith.constant 0 : i32
    %c0_i32_1 = arith.constant 0 : i32
    %c0_i32_2 = arith.constant 0 : i32
    return %c0_i32, %c0_i32_0, %c0_i32_1 : i32, i32, i32
  }
  func.func @transform_4(%arg0: i32) -> (i32, i32, i32) {
    %c0_i32 = arith.constant 0 : i32
    %c0_i32_0 = arith.constant 0 : i32
    %c0_i32_1 = arith.constant 0 : i32
    %c0_i32_2 = arith.constant 0 : i32
    return %c0_i32, %c0_i32_0, %c0_i32_1 : i32, i32, i32
  }
  func.func @transform_5(%arg0: i32) -> (i32, i32) {
    %c0_i32 = arith.constant 0 : i32
    %c0_i32_0 = arith.constant 0 : i32
    %c0_i32_1 = arith.constant 0 : i32
    return %c0_i32, %c0_i32_0 : i32, i32
  }
  func.func @transform_6(%arg0: i32) -> (i32, i32) {
    %c0_i32 = arith.constant 0 : i32
    %c0_i32_0 = arith.constant 0 : i32
    %c0_i32_1 = arith.constant 0 : i32
    return %c0_i32, %c0_i32_0 : i32, i32
  }
  func.func @transform_7(%arg0: i32) -> (i32, i32) {
    %c0_i32 = arith.constant 0 : i32
    %c0_i32_0 = arith.constant 0 : i32
    %c0_i32_1 = arith.constant 0 : i32
    return %c0_i32, %c0_i32_0 : i32, i32
  }
  func.func @transform_8(%arg0: i32) -> (i32, i32) {
    %c0_i32 = arith.constant 0 : i32
    %c0_i32_0 = arith.constant 0 : i32
    %c0_i32_1 = arith.constant 0 : i32
    return %c0_i32, %c0_i32_0 : i32, i32
  }
  func.func @transform_9(%arg0: i32) -> (i32, i32, i32) {
    %c0_i32 = arith.constant 0 : i32
    %c0_i32_0 = arith.constant 0 : i32
    %c0_i32_1 = arith.constant 0 : i32
    return %arg0, %c0_i32, %c0_i32_0 : i32, i32, i32
  }
}

</mosaic_0001>

<bundles_post_ra>
// kernel: tpu_custom_call.1
= control target key start
LH: loop header
LB: loop body
LE: loop exit
PB: predicated region body
PF: predicated region fallthrough
CT: control target
= control target key end

     0   :  { %s3280_s0 = inlined_call_operand.hbm [shape: bf16[2,256,128], index: 0, kind: input, shape index: {}]   ;;  %s3281_s1 = inlined_call_operand.hbm [shape: bf16[2,256,256], index: 1, kind: input, shape index: {}]   ;;  %s3282_s2 = inlined_call_operand.hbm [shape: bf16[2,16,256], index: 2, kind: input, shape index: {}]   ;;  %s3283_s3 = inlined_call_operand.hbm [shape: bf16[3,128,128], index: 3, kind: input, shape index: {}]   ;;  %s3284_s4 = inlined_call_operand.vmem [shape: f32[3,1,128], index: 4, kind: input, shape index: {}]   ;;  %s3285_s5 = inlined_call_operand.hbm [shape: bf16[128,128], index: 5, kind: input, shape index: {}]   ;;  %s3286_s6 = inlined_call_operand.vmem [shape: f32[1,128], index: 6, kind: input, shape index: {}]   ;;  %s3287_s7 = inlined_call_operand.vmem [shape: f32[1,128], index: 7, kind: input, shape index: {}]   ;;  %s3288_s8 = inlined_call_operand.<no memory space> [shape: f32[1,1], index: 8, kind: input, shape index: {}]   ;;  %s3289_s9 = inlined_call_operand.vmem [shape: f32[2,16,1], index: 9, kind: output, shape index: {}]  }
   0x1   :  { %3301 = sst [smem:[#allocation19_spill]] %s3281_s1  ;;  %v14_v0 = vstv %s3288_s8 }
   0x2   :  { %3302 = sst [smem:[#allocation20_spill]] %s3283_s3  ;;  %15 = vst [vmem:[#allocation2] sm:$0x1] %v14_v0 }
   0x3   :  { %16 = vsyncpa [#allocation4], 0 }
   0x4   :  { %18 = vsyncpa [#allocation4 + $0x1], 0 }
   0x5   :  { %19 = vsyncpa [#allocation6], 0 }
   0x6   :  { %21 = vsyncpa [#allocation6 + $0x1], 0 }
   0x7   :  { %22 = vsyncpa [#allocation9], 0  ;;  %s2738_s11 = smov 0   ;;  %s2740_s12 = smov 0  }
   0x8   :  { %s2742_s13 = smov 0   ;;  %s2744_s14 = smov 0  }
   0x9 LB: > { %3303 = sst [smem:[#allocation14_spill]] %s2673_s13  ;;  %s2757_s8 = sadd.s32 4294967295, %s2677_s14   ;;  %s2677_s14 = sphi %s2744_s14, %s3320_s14   ;;  %s2673_s13 = sphi %s2742_s13, %s3322_s13   ;;  %s2669_s12 = sphi %s2740_s12, %s3324_s12   ;;  %s2665_s11 = sphi %s2738_s11, %s3323_s11  }
   0xa   : > { %p48_p0 = scmp.ne.s32.totalorder %s2669_s12, %s2665_s11  ;;  %p49_p1 = scmp.eq.s32.totalorder %s2757_s8, 0 }
   0xb   : > { %p1950_p2 = scmp.ge.s32.totalorder %s2677_s14, 1  ;;  %p263_p3 = scmp.lt.s32.totalorder %s2677_s14, 3 }
   0xc   : > { %p2765_p4 = por %p49_p1, %p48_p0  ;;  %s3305_s3 = sld [smem:[#allocation20_spill]] }
   0xd   : > { %p2772_p5 = pnand %p1950_p2, %p263_p3  ;;  %s2679_s20 = smov [#allocation8]  }
   0xe   : > { %s276_s21 = sshll.u32 %s2679_s20, 4  ;;  %s2785_s23 = sadd.s32 1, %s2677_s14   ;;  %s277_s21 = int_to_ptr.vmem [resolvable:$true] %s276_s21 }
   0xf   : > { %p2419_p6 = pneg %p2772_p5  ;;  %3308 = sst [smem:[#allocation15_spill]] %s2785_s23 }
  0x10   : > { %s3290_s24 = smov 64   ;;  %s3292_s25 = smov 4  }
  0x11   : > { %p2780_p7 = pnand %p2419_p6, %p49_p1  ;;  %s32_s26 = ssub.s32 %s2677_s14, %s2785_s23 }
  0x12   : > { %s274_s18 = sshll.u32 %s3305_s3, 4  ;;  %s35_s27 = sadd.s32 1, %s2673_s13  ;;  %s275_s18 = int_to_ptr.hbm [resolvable:$true] %s274_s18 }
  0x13   : > { %2422 = dma.hbm_to_vmem [thread:$0]  (!%p2780_p7), %s275_s18, 3072, %s277_s21, [#allocation9], %s3290_s24, %s3290_s24, %s3292_s25  }
  0x14   : > { %p33_p8 = scmp.eq.s32.totalorder %s32_s26, 0  ;;  %p42_p9 = scmp.ne.s32.totalorder %s2673_s13, %s2669_s12 }
  0x15   : > { %p43_p10 = scmp.eq.s32.totalorder %s2677_s14, 0  ;;  %p2438_p11 = scmp.lt.s32.totalorder %s2677_s14, 2 }
  0x16   : > { %s2800_s28 = scalar_select %p33_p8, %s2673_s13, %s35_s27  }
  0x17   : > { %p44_p12 = por %p43_p10, %p42_p9  ;;  %s2803_s29 = sand.u32 1, %s2673_s13  }
  0x18   : > { %3309 = sst [smem:[#allocation16_spill]] %s2800_s28  ;;  %s338_s30 = sand.u32 1, %s2677_s14  }
  0x19   : > { %s1957_s10 = sshll.u32 %s2803_s29, 8  ;;  %p2807_p13 = pnand %p2438_p11, %p44_p12 }
  0x1a   : > { %s2304_s16 = sshll.u32 %s2677_s14, 8  ;;  %s3311_s1 = sld [smem:[#allocation19_spill]] }
  0x1b   : > { %s342_s26 = scalar_lea.vmem [#allocation5], %s1957_s10  ;;  %s2815_s24 = scalar_lea.sflag [#allocation6], %s338_s30 }
  0x1c   : > { %s350_s27 = sshll.u32 %s342_s26, 4  ;;  %p2519_p2 = pneg %p2807_p13  ;;  %s351_s27 = int_to_ptr.vmem [resolvable:$true] %s350_s27 }
  0x20   : > { %s347_s20 = scalar_lea.hbm %s3311_s1, %s2304_s16  ;;  %s2522_s16 = scalar_lea.hbm %s3311_s1, 512 }
  0x21   : > { %s348_s21 = sshll.u32 %s347_s20, 4  ;;  %s349_s21 = int_to_ptr.hbm [resolvable:$true] %s348_s21 }
  0x22   : > { %s2515_s25 = sshra.s32 %s349_s21, 4  ;;  %s2516_s25 = int_to_ptr.hbm [resolvable:$true] %s2515_s25 }
  0x23   : > { %s2517_s3 = scalar_lea.hbm %s2516_s25, 256  ;;  %p2523_p8 = scmp.lt.s32.totalorder %s2516_s25, %s3311_s1 }
  0x24   : > { %p2518_p0 = scmp.ne.s32.totalorder %s2516_s25, %s2517_s3  ;;  %p2524_p9 = scmp.lt.s32.totalorder %s2522_s16, %s2517_s3 }
  0x26   : > { %p2520_p3 = pnand %p2519_p2, %p2518_p0  ;;  %p2525_p10 = por %p2524_p9, %p2523_p8 }
  0x28   : > { %p2521_p6 = pneg %p2520_p3 }
  0x2a   : > { %p2526_p11 = pnand %p2525_p10, %p2521_p6 }
  0x2c   : > { %2529 = shalt.err (!%p2526_p11)
}
  0x2d   : > { %s3297_s30 = smov 128   ;;  %s3298_s20 = smov 8  }
  0x2e   : > { %2432 = dma.hbm_to_vmem [thread:$0]  (!%p2807_p13), %s349_s21, 4096, %s351_s27, %s2815_s24, %s3297_s30, %s3297_s30, %s3298_s20  }
  0x2f   : > { %s291_s3 = sshll.u32 %s3285_s5, 4  ;;  %s2684_s25 = smov [#allocation10]   ;;  %s292_s3 = int_to_ptr.hbm [resolvable:$true] %s291_s3 }
  0x30   : > { %s293_s17 = sshll.u32 %s2684_s25, 4  ;;  %s3312_s16 = smov 4   ;;  %s294_s17 = int_to_ptr.vmem [resolvable:$true] %s293_s17 }
  0x31   : > { %s3313_s10 = smov 64   ;;  %s1954_s18 = sshll.u32 %s2803_s29, 7 }
  0x32   : > { %2425 = dma.hbm_to_vmem [thread:$0]  (!%p2780_p7), %s292_s3, 1024, %s294_s17, [#allocation9], %s3313_s10, %s3313_s10, %s3312_s16  }
  0x33   : > { %s2303_s1 = sshll.u32 %s2677_s14, 7  ;;  %s320_s30 = scalar_lea.vmem [#allocation3], %s1954_s18 }
  0x34   : > { %s325_s21 = scalar_lea.hbm %s3280_s0, %s2303_s1  ;;  %s328_s28 = sshll.u32 %s320_s30, 4  ;;  %s329_s28 = int_to_ptr.vmem [resolvable:$true] %s328_s28 }
  0x35   : > { %s326_s27 = sshll.u32 %s325_s21, 4  ;;  %s317_s26 = scalar_lea.sflag [#allocation4], %s2803_s29  ;;  %s327_s27 = int_to_ptr.hbm [resolvable:$true] %s326_s27 }
  0x36   : > { %s2575_s25 = sshra.s32 %s327_s27, 4  ;;  %s2582_s17 = scalar_lea.hbm %s3280_s0, 256  ;;  %s2576_s25 = int_to_ptr.hbm [resolvable:$true] %s2575_s25 }
  0x37   : > { %s2577_s20 = scalar_lea.hbm %s2576_s25, 128  ;;  %p2583_p3 = scmp.lt.s32.totalorder %s2576_s25, %s3280_s0 }
  0x38   : > { %p2578_p12 = scmp.ne.s32.totalorder %s2576_s25, %s2577_s20  ;;  %p2584_p6 = scmp.lt.s32.totalorder %s2582_s17, %s2577_s20 }
  0x3a   : > { %p2580_p0 = pnand %p2578_p12, %p2519_p2  ;;  %p2585_p8 = por %p2584_p6, %p2583_p3 }
  0x3c   : > { %p2581_p7 = pneg %p2580_p0 }
  0x3e   : > { %p2586_p9 = pnand %p2585_p8, %p2581_p7 }
  0x40   : > { %2589 = shalt.err (!%p2586_p9)
}
  0x41   : > { %2429 = dma.hbm_to_vmem [thread:$0]  (!%p2807_p13), %s327_s27, 2048, %s329_s28, %s317_s26, %s3313_s10, %s3313_s10, %s3312_s16  }
  0x42   : > { %s1960_s23 = sshll.u32 %s2803_s29, 4  ;;  %s2305_s30 = sshll.u32 %s2677_s14, 4 }
  0x43   : > { %s369_s22 = scalar_lea.hbm %s3282_s2, %s2305_s30  ;;  %s364_s20 = scalar_lea.vmem [#allocation7], %s1960_s23 }
  0x44   : > { %s370_s25 = sshll.u32 %s369_s22, 4  ;;  %s372_s3 = sshll.u32 %s364_s20, 4  ;;  %s371_s25 = int_to_ptr.hbm [resolvable:$true] %s370_s25  ;;  %s373_s3 = int_to_ptr.vmem [resolvable:$true] %s372_s3 }
  0x45   : > { %s2605_s17 = sshra.s32 %s371_s25, 4  ;;  %s2612_s14 = scalar_lea.hbm %s3282_s2, 32  ;;  %s2606_s17 = int_to_ptr.hbm [resolvable:$true] %s2605_s17 }
  0x46   : > { %s2607_s13 = scalar_lea.hbm %s2606_s17, 16  ;;  %p2613_p0 = scmp.lt.s32.totalorder %s2606_s17, %s3282_s2 }
  0x47   : > { %p2608_p10 = scmp.ne.s32.totalorder %s2606_s17, %s2607_s13  ;;  %p2614_p7 = scmp.lt.s32.totalorder %s2612_s14, %s2607_s13 }
  0x49   : > { %p2610_p11 = pnand %p2608_p10, %p2519_p2  ;;  %p2615_p3 = por %p2614_p7, %p2613_p0 }
  0x4b   : > { %p2611_p12 = pneg %p2610_p11 }
  0x4d   : > { %p2616_p6 = pnand %p2615_p3, %p2611_p12 }
  0x4f   : > { %2619 = shalt.err (!%p2616_p6)
}
  0x50   : > { %s3314_s28 = smov 8   ;;  %s3315_s26 = smov 128  }
  0x51   : > { %2435 = dma.hbm_to_vmem [thread:$0]  (!%p2807_p13), %s371_s25, 256, %s373_s3, %s2815_s24, %s3315_s26, %s3315_s26, %s3314_s28  }
  0x52   : > { %384 = sbr.rel (%p2772_p5) target bundleno = 1787 (0x6fb), region = 56 }
  0x57   : > { %s386_s1 = sand.u32 1, %s2669_s12  }
  0x58   : > { %s1964_s23 = sshll.u32 %s386_s1, 7  ;;  %s387_s30 = scalar_lea.sflag [#allocation4], %s386_s1 }
  0x59   : > { %s2885_s18 = scalar_lea.vmem [#allocation3], %s1964_s23 }
  0x5a   : > { %2652 = dma.done.wait (%p2765_p4), %s387_s30, 2048  }
  0x5b   : > { %2654 = vsyncadd (%p2765_p4), %s387_s30, 4294965248  ;;  %s396_s11 = sand.u32 1, %s2757_s8   ;;  %s1965_s21 = sshll.u32 %s386_s1, 8 }
  0x5c   : > { %s397_s24 = scalar_lea.sflag [#allocation6], %s396_s11  ;;  %s2892_s22 = scalar_lea.vmem [#allocation5], %s1965_s21 }
  0x5d   : > { %2656 = dma.done.wait (%p2765_p4), %s397_s24, 4352  }
  0x5e   : > { %2658 = vsyncadd (%p2765_p4), %s397_s24, 4294962944  ;;  %s1966_s19 = sshll.u32 %s386_s1, 4 }
  0x5f   : > { %s2898_s25 = scalar_lea.vmem [#allocation7], %s1966_s19 }
  0x60   : > { %2660 = dma.done.wait (%p49_p1), [#allocation9], 4096  }
  0x61   : > { %2662 = vsyncadd (%p49_p1), [#allocation9], 4294963200  ;;  %v2314_v1 = vld [vmem:[%s2885_s18 + $0x38] sm:$0xff]  ;;  %v2313_v3 = vld [vmem:[%s2885_s18 + $0x30] sm:$0xff]  ;;  %p466_p1 = scmp.lt.s32.totalorder %s2757_s8, 1  ;;  %vm1817_vm0 = vcmask 7168  }
  0x62   : > { %v2322_v2 = vld [vmem:[%s2885_s18 + $0x78] sm:$0xff]  ;;  %791 = vmatpush.bf16.msra.mxu0 %v2314_v1  ;;  %v2321_v4 = vld [vmem:[%s2885_s18 + $0x70] sm:$0xff]  ;;  %2389 = vmatpush.bf16.msra.mxu2 %v2314_v1  ;;  %v2312_v5 = vld [vmem:[%s2885_s18 + $0x28] sm:$0xff] }
  0x63   : > { %880 = vmatpush.bf16.msra.mxu1 %v2322_v2  ;;  %2397 = vmatpush.bf16.msra.mxu3 %v2322_v2  ;;  %v2320_v6 = vld [vmem:[%s2885_s18 + $0x68] sm:$0xff]  ;;  %v2311_v7 = vld [vmem:[%s2885_s18 + $0x20] sm:$0xff]  ;;  %v2310_v9 = vld [vmem:[%s2885_s18 + $0x18] sm:$0xff]  ;;  %s3326_s8 = smov (!%p466_p1, %s2757_s8), 1 }
  0x64   : > { %v2319_v8 = vld [vmem:[%s2885_s18 + $0x60] sm:$0xff]  ;;  %v2318_v10 = vld [vmem:[%s2885_s18 + $0x58] sm:$0xff]  ;;  %v2309_v11 = vld [vmem:[%s2885_s18 + $0x10] sm:$0xff]  ;;  %s2306_s28 = sshll.u32 %s3326_s8, 4 }
  0x65   : > { %v2317_v12 = vld [vmem:[%s2885_s18 + $0x50] sm:$0xff]  ;;  %v2308_v13 = vld [vmem:[%s2885_s18 + $0x8] sm:$0xff]  ;;  %v2307_v15 = vld [vmem:[%s2885_s18] sm:$0xff]  ;;  %s470_s23 = scalar_lea.vmem %s3289_s9, %s2306_s28 }
  0x66   : > { %792 = vmatpush.bf16.msra.mxu0 %v2313_v3  ;;  %2390 = vmatpush.bf16.msra.mxu2 %v2313_v3  ;;  %v2316_v14 = vld [vmem:[%s2885_s18 + $0x48] sm:$0xff]  ;;  %v2315_v16 = vld [vmem:[%s2885_s18 + $0x40] sm:$0xff]  ;;  %v1981_v29 = vld [vmem:[%s2892_s22 + $0x10] sm:$0xf] }
  0x67   : > { %881 = vmatpush.bf16.msra.mxu1 %v2321_v4  ;;  %2398 = vmatpush.bf16.msra.mxu3 %v2321_v4  ;;  %v1973_v17 = vld [vmem:[%s2892_s22] sm:$0xf]  ;;  %v2324_v18 = vld [vmem:[%s2892_s22 + $0x4] sm:$0xf0]  ;;  %v2323_v19 = vld [vmem:[%s2892_s22 + $0x4] sm:$0xf] }
  0x68   : > { %v1975_v20 = vld [vmem:[%s2892_s22 + $0x8] sm:$0xf0]  ;;  %v2924_v21 = vor.u32 %v2324_v18, %v1973_v17  ;;  %v2053_v23 = vld [vmem:[%s2892_s22 + $0xa0] sm:$0xf]  ;;  %v2344_v24 = vld [vmem:[%s2892_s22 + $0xa4] sm:$0xf0] }
  0x69   : > { %v2926_v22 = vor.u32 %v2323_v19, %v1975_v20  ;;  %v2343_v25 = vld [vmem:[%s2892_s22 + $0xa4] sm:$0xf]  ;;  %v2933_v26 = vor.u32 %v2344_v24, %v2053_v23  ;;  %v2055_v27 = vld [vmem:[%s2892_s22 + $0xa8] sm:$0xf0]  ;;  %v2326_v30 = vld [vmem:[%s2892_s22 + $0x14] sm:$0xf0] }
  0x6a   : > { %793 = vmatpush.bf16.msra.mxu0 %v2312_v5  ;;  %2391 = vmatpush.bf16.msra.mxu2 %v2312_v5  ;;  %v2936_v28 = vor.u32 %v2343_v25, %v2055_v27  ;;  %v2325_v31 = vld [vmem:[%s2892_s22 + $0x14] sm:$0xf]  ;;  %v1983_v32 = vld [vmem:[%s2892_s22 + $0x18] sm:$0xf0]  ;;  %v2944_v33 = vor.u32 %v2326_v30, %v1981_v29  ;;  %v2061_v35 = vld [vmem:[%s2892_s22 + $0xb0] sm:$0xf] }
  0x6b   : > { %882 = vmatpush.bf16.msra.mxu1 %v2320_v6  ;;  %2399 = vmatpush.bf16.msra.mxu3 %v2320_v6  ;;  %v2946_v34 = vor.u32 %v2325_v31, %v1983_v32  ;;  %v2346_v36 = vld [vmem:[%s2892_s22 + $0xb4] sm:$0xf0]  ;;  %v2345_v37 = vld [vmem:[%s2892_s22 + $0xb4] sm:$0xf]  ;;  %v2063_v39 = vld [vmem:[%s2892_s22 + $0xb8] sm:$0xf0] }
  0x6c   : > { %v2953_v38 = vor.u32 %v2346_v36, %v2061_v35  ;;  %v2956_v40 = vor.u32 %v2345_v37, %v2063_v39  ;;  %v1989_v41 = vld [vmem:[%s2892_s22 + $0x20] sm:$0xf]  ;;  %v2328_v42 = vld [vmem:[%s2892_s22 + $0x24] sm:$0xf0]  ;;  %v2327_v43 = vld [vmem:[%s2892_s22 + $0x24] sm:$0xf] }
  0x6d   : > { %v1991_v44 = vld [vmem:[%s2892_s22 + $0x28] sm:$0xf0]  ;;  %v2964_v45 = vor.u32 %v2328_v42, %v1989_v41  ;;  %v2069_v47 = vld [vmem:[%s2892_s22 + $0xc0] sm:$0xf]  ;;  %v2348_v48 = vld [vmem:[%s2892_s22 + $0xc4] sm:$0xf0] }
  0x6e   : > { %794 = vmatpush.bf16.msra.mxu0 %v2311_v7  ;;  %2392 = vmatpush.bf16.msra.mxu2 %v2311_v7  ;;  %v2966_v46 = vor.u32 %v2327_v43, %v1991_v44  ;;  %v2347_v49 = vld [vmem:[%s2892_s22 + $0xc4] sm:$0xf]  ;;  %v2973_v50 = vor.u32 %v2348_v48, %v2069_v47  ;;  %v2071_v51 = vld [vmem:[%s2892_s22 + $0xc8] sm:$0xf0]  ;;  %v1997_v53 = vld [vmem:[%s2892_s22 + $0x30] sm:$0xf] }
  0x6f   : > { %883 = vmatpush.bf16.msra.mxu1 %v2319_v8  ;;  %2400 = vmatpush.bf16.msra.mxu3 %v2319_v8  ;;  %v2976_v52 = vor.u32 %v2347_v49, %v2071_v51  ;;  %v2330_v54 = vld [vmem:[%s2892_s22 + $0x34] sm:$0xf0]  ;;  %v2329_v55 = vld [vmem:[%s2892_s22 + $0x34] sm:$0xf]  ;;  %v1999_v56 = vld [vmem:[%s2892_s22 + $0x38] sm:$0xf0] }
  0x70   : > { %v2984_v57 = vor.u32 %v2330_v54, %v1997_v53  ;;  %v2986_v58 = vor.u32 %v2329_v55, %v1999_v56  ;;  %v2077_v59 = vld [vmem:[%s2892_s22 + $0xd0] sm:$0xf]  ;;  %v2350_v60 = vld [vmem:[%s2892_s22 + $0xd4] sm:$0xf0]  ;;  %v2349_v61 = vld [vmem:[%s2892_s22 + $0xd4] sm:$0xf] }
  0x71   : > { %v2993_v62 = vor.u32 %v2350_v60, %v2077_v59  ;;  %v2079_v63 = vld [vmem:[%s2892_s22 + $0xd8] sm:$0xf0]  ;;  %v2005_v1 = vld [vmem:[%s2892_s22 + $0x40] sm:$0xf]  ;;  %v2332_v2 = vld [vmem:[%s2892_s22 + $0x44] sm:$0xf0] }
  0x72   : > { %795 = vmatpush.bf16.msra.mxu0 %v2310_v9  ;;  %2393 = vmatpush.bf16.msra.mxu2 %v2310_v9  ;;  %v2996_v0 = vor.u32 %v2349_v61, %v2079_v63  ;;  %v2331_v3 = vld [vmem:[%s2892_s22 + $0x44] sm:$0xf]  ;;  %v2007_v4 = vld [vmem:[%s2892_s22 + $0x48] sm:$0xf0]  ;;  %v3004_v5 = vor.u32 %v2332_v2, %v2005_v1  ;;  %v2085_v7 = vld [vmem:[%s2892_s22 + $0xe0] sm:$0xf] }
  0x73   : > { %884 = vmatpush.bf16.msra.mxu1 %v2318_v10  ;;  %2401 = vmatpush.bf16.msra.mxu3 %v2318_v10  ;;  %v3006_v6 = vor.u32 %v2331_v3, %v2007_v4  ;;  %v2352_v8 = vld [vmem:[%s2892_s22 + $0xe4] sm:$0xf0]  ;;  %v2351_v9 = vld [vmem:[%s2892_s22 + $0xe4] sm:$0xf]  ;;  %v2333_v17 = vld [vmem:[%s2892_s22 + $0x54] sm:$0xf] }
  0x74   : > { %v3013_v10 = vor.u32 %v2352_v8, %v2085_v7  ;;  %v2015_v18 = vld [vmem:[%s2892_s22 + $0x58] sm:$0xf0]  ;;  %v2093_v23 = vld [vmem:[%s2892_s22 + $0xf0] sm:$0xf]  ;;  %v2354_v24 = vld [vmem:[%s2892_s22 + $0xf4] sm:$0xf0] }
  0x75   : > { %v3026_v20 = vor.u32 %v2333_v17, %v2015_v18  ;;  %v2353_v25 = vld [vmem:[%s2892_s22 + $0xf4] sm:$0xf]  ;;  %v3033_v27 = vor.u32 %v2354_v24, %v2093_v23  ;;  %v2095_v29 = vld [vmem:[%s2892_s22 + $0xf8] sm:$0xf0]  ;;  %v2360_v30 = vld [vmem:[#allocation8 + $0x28] sm:$0xff] }
  0x76   : > { %796 = vmatpush.bf16.msra.mxu0 %v2309_v11  ;;  %2394 = vmatpush.bf16.msra.mxu2 %v2309_v11  ;;  %v2087_v11 = vld [vmem:[%s2892_s22 + $0xe8] sm:$0xf0]  ;;  %v3036_v31 = vor.u32 %v2353_v25, %v2095_v29  ;;  %v2359_v32 = vld [vmem:[#allocation8 + $0x20] sm:$0xff]  ;;  %v2358_v35 = vld [vmem:[#allocation8 + $0x18] sm:$0xff] }
  0x77   : > { %885 = vmatpush.bf16.msra.mxu1 %v2317_v12  ;;  %2402 = vmatpush.bf16.msra.mxu3 %v2317_v12  ;;  %v2362_v12 = vld [vmem:[#allocation8 + $0x38] sm:$0xff]  ;;  %v2021_v36 = vld [vmem:[%s2892_s22 + $0x60] sm:$0xf]  ;;  %v2336_v37 = vld [vmem:[%s2892_s22 + $0x64] sm:$0xf0] }
  0x78   : > { %3317 = vst [vmem:[#allocation18_spill] sm:$0xff] %v3036_v31  ;;  %v2335_v39 = vld [vmem:[%s2892_s22 + $0x64] sm:$0xf]  ;;  %v2023_v41 = vld [vmem:[%s2892_s22 + $0x68] sm:$0xf0]  ;;  %v3044_v42 = vor.u32 %v2336_v37, %v2021_v36  ;;  %v2357_v44 = vld [vmem:[#allocation8 + $0x10] sm:$0xff] }
  0x79   : > { %v3046_v43 = vor.u32 %v2335_v39, %v2023_v41  ;;  %v2356_v47 = vld [vmem:[#allocation8 + $0x8] sm:$0xff]  ;;  %v2355_v48 = vld [vmem:[#allocation8] sm:$0xff]  ;;  %v2029_v49 = vld [vmem:[%s2892_s22 + $0x70] sm:$0xf] }
  0x7a   : > { %797 = vmatpush.bf16.msra.mxu0 %v2308_v13  ;;  %2395 = vmatpush.bf16.msra.mxu2 %v2308_v13  ;;  %v3016_v13 = vor.u32 %v2351_v9, %v2087_v11  ;;  %v2338_v51 = vld [vmem:[%s2892_s22 + $0x74] sm:$0xf0]  ;;  %v2337_v53 = vld [vmem:[%s2892_s22 + $0x74] sm:$0xf]  ;;  %v2031_v54 = vld [vmem:[%s2892_s22 + $0x78] sm:$0xf0] }
  0x7b   : > { %886 = vmatpush.bf16.msra.mxu1 %v2316_v14  ;;  %2403 = vmatpush.bf16.msra.mxu3 %v2316_v14  ;;  %v2361_v14 = vld [vmem:[#allocation8 + $0x30] sm:$0xff]  ;;  %v3054_v55 = vor.u32 %v2338_v51, %v2029_v49  ;;  %v3056_v56 = vor.u32 %v2337_v53, %v2031_v54  ;;  %v2037_v59 = vld [vmem:[%s2892_s22 + $0x80] sm:$0xf]  ;;  %v2340_v60 = vld [vmem:[%s2892_s22 + $0x84] sm:$0xf0] }
  0x7c   : > { %3316 = vst [vmem:[#allocation17_spill] sm:$0xff] %v3016_v13  ;;  %v2339_v61 = vld [vmem:[%s2892_s22 + $0x84] sm:$0xf]  ;;  %v2039_v63 = vld [vmem:[%s2892_s22 + $0x88] sm:$0xf0]  ;;  %v3064_v1 = vor.u32 %v2340_v60, %v2037_v59 }
  0x7d   : > { %v3066_v2 = vor.u32 %v2339_v61, %v2039_v63  ;;  %v2047_v17 = vld [vmem:[%s2892_s22 + $0x98] sm:$0xf0] }
  0x7e   : > { %798 = vmatpush.bf16.msra.mxu0 %v2307_v15  ;;  %2396 = vmatpush.bf16.msra.mxu2 %v2307_v15  ;;  %v2013_v15 = vld [vmem:[%s2892_s22 + $0x50] sm:$0xf] }
  0x7f   : > { %887 = vmatpush.bf16.msra.mxu1 %v2315_v16  ;;  %2404 = vmatpush.bf16.msra.mxu3 %v2315_v16  ;;  %v2334_v16 = vld [vmem:[%s2892_s22 + $0x54] sm:$0xf0] }
  0x80   : > { %v3024_v19 = vor.u32 %v2334_v16, %v2013_v15  ;;  %v2342_v15 = vld [vmem:[%s2892_s22 + $0x94] sm:$0xf0]  ;;  %v2341_v16 = vld [vmem:[%s2892_s22 + $0x94] sm:$0xf] }
  0x81   : > { %799 = vmatmul.bf16.vlgmr.msra.gmra.mxu0 %v2924_v21  ;;  %849 = vmatmul.bf16.vlgmr.msra.gmra.mxu2 %v2933_v26  ;;  %v3076_v23 = vor.u32 %v2341_v16, %v2047_v17 }
  0x82   : > { %888 = vmatmul.bf16.vlgmr.msra.gmra.mxu1 %v2926_v22  ;;  %938 = vmatmul.bf16.vlgmr.msra.gmra.mxu3 %v2936_v28 }
  0x83   : > { %1053 = vmatpush.bf16.msrb.mxu2 %v2362_v12 }
  0x87   : > { %1054 = vmatpush.bf16.msrb.mxu2 %v2361_v14  ;;  %v2045_v14 = vld [vmem:[%s2892_s22 + $0x90] sm:$0xf] }
  0x88   : > { %v3074_v18 = vor.u32 %v2342_v15, %v2045_v14 }
  0x8b   : > { %1055 = vmatpush.bf16.msrb.mxu2 %v2360_v30 }
  0x8f   : > { %1056 = vmatpush.bf16.msrb.mxu2 %v2359_v32 }
  0x91   : > { %804 = vmatmul.bf16.gmra.mxu0 %v2944_v33  ;;  %854 = vmatmul.bf16.gmra.mxu2 %v2953_v38 }
  0x92   : > { %893 = vmatmul.bf16.gmra.mxu1 %v2946_v34  ;;  %943 = vmatmul.bf16.gmra.mxu3 %v2956_v40 }
  0x93   : > { %1057 = vmatpush.bf16.msrb.mxu2 %v2358_v35 }
  0x97   : > { %1058 = vmatpush.bf16.msrb.mxu2 %v2357_v44 }
  0x9b   : > { %1059 = vmatpush.bf16.msrb.mxu2 %v2356_v47 }
  0x9f   : > { %1060 = vmatpush.bf16.msrb.mxu2 %v2355_v48 }
  0xa1   : > { %809 = vmatmul.bf16.gmra.mxu0 %v2964_v45  ;;  %859 = vmatmul.bf16.gmra.mxu2 %v2973_v50 }
  0xa2   : > { %898 = vmatmul.bf16.gmra.mxu1 %v2966_v46  ;;  %948 = vmatmul.bf16.gmra.mxu3 %v2976_v52 }
  0xb1   : > { %814 = vmatmul.bf16.gmra.mxu0 %v2984_v57  ;;  %864 = vmatmul.bf16.gmra.mxu2 %v2993_v62 }
  0xb2   : > { %903 = vmatmul.bf16.gmra.mxu1 %v2986_v58  ;;  %953 = vmatmul.bf16.gmra.mxu3 %v2996_v0 }
  0xc1   : > { %819 = vmatmul.bf16.gmra.mxu0 %v3004_v5  ;;  %869 = vmatmul.bf16.gmra.mxu2 %v3013_v10 }
  0xc2   : > { %908 = vmatmul.bf16.gmra.mxu1 %v3006_v6  ;;  %958 = vmatmul.bf16.gmra.mxu3 %v3016_v13 }
  0xd1   : > { %824 = vmatmul.bf16.gmra.mxu0 %v3024_v19  ;;  %874 = vmatmul.bf16.gmra.mxu2 %v3033_v27 }
  0xd2   : > { %913 = vmatmul.bf16.gmra.mxu1 %v3026_v20  ;;  %963 = vmatmul.bf16.gmra.mxu3 %v3036_v31 }
  0xe1   : > { %829 = vmatmul.bf16.gmra.mxu0 %v3044_v42 }
  0xe2   : > { %918 = vmatmul.bf16.gmra.mxu1 %v3046_v43 }
  0xf1   : > { %834 = vmatmul.bf16.gmra.mxu0 %v3054_v55 }
  0xf2   : > { %923 = vmatmul.bf16.gmra.mxu1 %v3056_v56 }
  0xfe   : > { %v800_v3 = vpop.f32.mrf.mxu0 }
  0xff   : > { %v889_v4 = vpop.f32.mrf.mxu1 }
 0x100   : > { %v890_v9 = vadd.f32 %v889_v4, %v800_v3 }
 0x101   : > { %839 = vmatmul.bf16.gmra.mxu0 %v3064_v1 }
 0x102   : > { %928 = vmatmul.bf16.gmra.mxu1 %v3066_v2 }
 0x104   : > { %v3080_v37 = vpop.f32.mrf.mxu2 }
 0x106   : > { %v802_v7 = vpop.f32.mrf.mxu0 }
 0x107   : > { %v891_v8 = vpop.f32.mrf.mxu1 }
 0x108   : > { %v892_v11 = vadd.f32 %v891_v8, %v802_v7 }
 0x10a   : > { %v969_v12 = vpack.c.bf16 %v892_v11, %v890_v9 }
 0x10c   : > { %1061 = vmatmul.bf16.vlgmr.msrb.gmra.mxu2 %v969_v12  ;;  %v3082_v44 = vpop.f32.mrf.mxu2 }
 0x10e   : > { %v805_v24 = vpop.f32.mrf.mxu0 }
 0x10f   : > { %v894_v25 = vpop.f32.mrf.mxu1 }
 0x110   : > { %v895_v32 = vadd.f32 %v894_v25, %v805_v24 }
 0x111   : > { %844 = vmatmul.bf16.gmra.mxu0 %v3074_v18 }
 0x112   : > { %933 = vmatmul.bf16.gmra.mxu1 %v3076_v23 }
 0x114   : > { %v3084_v54 = vpop.f32.mrf.mxu2 }
 0x116   : > { %v807_v29 = vpop.f32.mrf.mxu0 }
 0x117   : > { %v896_v30 = vpop.f32.mrf.mxu1 }
 0x118   : > { %v897_v35 = vadd.f32 %v896_v30, %v807_v29 }
 0x11a   : > { %v970_v36 = vpack.c.bf16 %v897_v35, %v895_v32 }
 0x11c   : > { %1066 = vmatmul.bf16.gmra.mxu2 %v970_v36  ;;  %v3086_v7 = vpop.f32.mrf.mxu2 }
 0x11e   : > { %v810_v39 = vpop.f32.mrf.mxu0 }
 0x11f   : > { %v899_v41 = vpop.f32.mrf.mxu1 }
 0x120   : > { %v900_v49 = vadd.f32 %v899_v41, %v810_v39 }
 0x124   : > { %v3088_v12 = vpop.f32.mrf.mxu2 }
 0x126   : > { %v812_v47 = vpop.f32.mrf.mxu0 }
 0x127   : > { %v901_v48 = vpop.f32.mrf.mxu1 }
 0x128   : > { %v902_v51 = vadd.f32 %v901_v48, %v812_v47 }
 0x12a   : > { %v971_v53 = vpack.c.bf16 %v902_v51, %v900_v49 }
 0x12c   : > { %1071 = vmatmul.bf16.gmra.mxu2 %v971_v53  ;;  %v3090_v25 = vpop.f32.mrf.mxu2 }
 0x12e   : > { %v815_v59 = vpop.f32.mrf.mxu0 }
 0x12f   : > { %v904_v60 = vpop.f32.mrf.mxu1 }
 0x130   : > { %v905_v3 = vadd.f32 %v904_v60, %v815_v59 }
 0x134   : > { %v3092_v32 = vpop.f32.mrf.mxu2 }
 0x136   : > { %v817_v61 = vpop.f32.mrf.mxu0 }
 0x137   : > { %v906_v63 = vpop.f32.mrf.mxu1 }
 0x138   : > { %v907_v4 = vadd.f32 %v906_v63, %v817_v61 }
 0x13a   : > { %v972_v8 = vpack.c.bf16 %v907_v4, %v905_v3 }
 0x13c   : > { %1076 = vmatmul.bf16.gmra.mxu2 %v972_v8  ;;  %v3094_v51 = vpop.f32.mrf.mxu2 }
 0x13e   : > { %v820_v9 = vpop.f32.mrf.mxu0 }
 0x13f   : > { %v909_v11 = vpop.f32.mrf.mxu1 }
 0x140   : > { %v910_v16 = vadd.f32 %v909_v11, %v820_v9 }
 0x144   : > { %v3096_v63 = vpop.f32.mrf.mxu2 }
 0x146   : > { %v822_v14 = vpop.f32.mrf.mxu0 }
 0x147   : > { %v911_v15 = vpop.f32.mrf.mxu1 }
 0x148   : > { %v912_v17 = vadd.f32 %v911_v15, %v822_v14 }
 0x14a   : > { %v973_v24 = vpack.c.bf16 %v912_v17, %v910_v16 }
 0x14c   : > { %1081 = vmatmul.bf16.gmra.mxu2 %v973_v24  ;;  %v3098_v9 = vpop.f32.mrf.mxu2 }
 0x14e   : > { %v825_v29 = vpop.f32.mrf.mxu0 }
 0x14f   : > { %v914_v30 = vpop.f32.mrf.mxu1 }
 0x150   : > { %v915_v39 = vadd.f32 %v914_v30, %v825_v29 }
 0x154   : > { %v3100_v24 = vpop.f32.mrf.mxu2 }
 0x156   : > { %v827_v35 = vpop.f32.mrf.mxu0 }
 0x157   : > { %v916_v36 = vpop.f32.mrf.mxu1 }
 0x158   : > { %v917_v41 = vadd.f32 %v916_v36, %v827_v35  ;;  %v939_v35 = vpop.f32.mrf.mxu3 }
 0x159   : > { %v940_v31 = vadd.f32 %v939_v35, %v3080_v37 }
 0x15a   : > { %v974_v47 = vpack.c.bf16 %v917_v41, %v915_v39 }
 0x15c   : > { %1086 = vmatmul.bf16.gmra.mxu2 %v974_v47  ;;  %v3102_v41 = vpop.f32.mrf.mxu2 }
 0x15e   : > { %v830_v48 = vpop.f32.mrf.mxu0 }
 0x15f   : > { %v919_v49 = vpop.f32.mrf.mxu1 }
 0x160   : > { %v920_v60 = vadd.f32 %v919_v49, %v830_v48 }
 0x166   : > { %v832_v53 = vpop.f32.mrf.mxu0 }
 0x167   : > { %v921_v59 = vpop.f32.mrf.mxu1 }
 0x168   : > { %v922_v61 = vadd.f32 %v921_v59, %v832_v53  ;;  %v941_v53 = vpop.f32.mrf.mxu3 }
 0x16a   : > { %v975_v3 = vpack.c.bf16 %v922_v61, %v920_v60 }
 0x16c   : > { %1091 = vmatmul.bf16.gmra.mxu2 %v975_v3  ;;  %v3107_v3 = vld [vmem:[%s3284_s4] ss:$0 sm:$0xff] }
 0x16e   : > { %v835_v4 = vpop.f32.mrf.mxu0 }
 0x16f   : > { %v924_v8 = vpop.f32.mrf.mxu1 }
 0x170   : > { %v925_v15 = vadd.f32 %v924_v8, %v835_v4 }
 0x176   : > { %v837_v11 = vpop.f32.mrf.mxu0 }
 0x177   : > { %v926_v14 = vpop.f32.mrf.mxu1 }
 0x178   : > { %v927_v16 = vadd.f32 %v926_v14, %v837_v11 }
 0x17a   : > { %v976_v17 = vpack.c.bf16 %v927_v16, %v925_v15 }
 0x17c   : > { %1096 = vmatmul.bf16.gmra.mxu2 %v976_v17  ;;  %v944_v17 = vpop.f32.mrf.mxu3 }
 0x17e   : > { %v840_v29 = vpop.f32.mrf.mxu0 }
 0x17f   : > { %v929_v30 = vpop.f32.mrf.mxu1 }
 0x180   : > { %v930_v47 = vadd.f32 %v929_v30, %v840_v29 }
 0x186   : > { %v842_v36 = vpop.f32.mrf.mxu0 }
 0x187   : > { %v931_v39 = vpop.f32.mrf.mxu1 }
 0x188   : > { %v932_v48 = vadd.f32 %v931_v39, %v842_v36 }
 0x18a   : > { %v977_v49 = vpack.c.bf16 %v932_v48, %v930_v47 }
 0x18c   : > { %1101 = vmatmul.bf16.gmra.mxu2 %v977_v49  ;;  %v946_v49 = vpop.f32.mrf.mxu3 }
 0x18e   : > { %v845_v59 = vpop.f32.mrf.mxu0 }
 0x18f   : > { %v934_v60 = vpop.f32.mrf.mxu1  ;;  %v1062_v61 = vpop.f32.mrf.mxu2 }
 0x190   : > { %v1063_v4 = vadd.f32 %v3107_v3, %v1062_v61  ;;  %v935_v14 = vadd.f32 %v934_v60, %v845_v59  ;;  %v942_v61 = vadd.f32 %v941_v53, %v3082_v44 }
 0x192   : > { %v1142_v36 = vmax.f32 %v1063_v4, 0.0 }
 0x194   : > { %v949_v4 = vpop.f32.mrf.mxu3 }
 0x196   : > { %v847_v8 = vpop.f32.mrf.mxu0 }
 0x197   : > { %v936_v11 = vpop.f32.mrf.mxu1  ;;  %v1064_v16 = vpop.f32.mrf.mxu2 }
 0x198   : > { %v937_v15 = vadd.f32 %v936_v11, %v847_v8  ;;  %v1065_v29 = vadd.f32 %v3107_v3, %v1064_v16  ;;  %v979_v8 = vpack.c.bf16 %v942_v61, %v940_v31 }
 0x19a   : > { %v978_v30 = vpack.c.bf16 %v937_v15, %v935_v14  ;;  %v1143_v39 = vmax.f32 %v1065_v29, 0.0  ;;  %v945_v29 = vadd.f32 %v944_v17, %v3084_v54 }
 0x19c   : > { %1106 = vmatmul.bf16.gmra.mxu2 %v978_v30  ;;  %v3111_v47 = vpack.c.bf16 %v1143_v39, %v1142_v36  ;;  %v947_v30 = vadd.f32 %v946_v49, %v3086_v7  ;;  %v951_v37 = vpop.f32.mrf.mxu3 }
 0x19d   : > { %v952_v54 = vadd.f32 %v951_v37, %v3090_v25 }
 0x19e   : > { %v980_v36 = vpack.c.bf16 %v947_v30, %v945_v29 }
 0x19f   : > { %v1067_v48 = vpop.f32.mrf.mxu2 }
 0x1a0   : > { %v1068_v13 = vadd.f32 %v3107_v3, %v1067_v48 }
 0x1a2   : > { %v1144_v11 = vmax.f32 %v1068_v13, 0.0 }
 0x1a4   : > { %v954_v61 = vpop.f32.mrf.mxu3 }
 0x1a7   : > { %v1069_v59 = vpop.f32.mrf.mxu2 }
 0x1a8   : > { %v1070_v60 = vadd.f32 %v3107_v3, %v1069_v59  ;;  %v950_v59 = vadd.f32 %v949_v4, %v3088_v12 }
 0x1aa   : > { %v1145_v16 = vmax.f32 %v1070_v60, 0.0  ;;  %v981_v60 = vpack.c.bf16 %v952_v54, %v950_v59 }
 0x1ac   : > { %1111 = vmatmul.bf16.gmra.mxu2 %v979_v8  ;;  %v3117_v14 = vpack.c.bf16 %v1145_v16, %v1144_v11  ;;  %v956_v8 = vpop.f32.mrf.mxu3 }
 0x1af   : > { %v1072_v15 = vpop.f32.mrf.mxu2 }
 0x1b0   : > { %v1073_v44 = vadd.f32 %v3107_v3, %v1072_v15 }
 0x1b2   : > { %v1146_v39 = vmax.f32 %v1073_v44, 0.0  ;;  %v955_v44 = vadd.f32 %v954_v61, %v3092_v32 }
 0x1b4   : > { %v959_v30 = vpop.f32.mrf.mxu3 }
 0x1b7   : > { %v1074_v35 = vpop.f32.mrf.mxu2 }
 0x1b8   : > { %v1075_v53 = vadd.f32 %v3107_v3, %v1074_v35  ;;  %v957_v35 = vadd.f32 %v956_v8, %v3094_v51 }
 0x1ba   : > { %v1147_v31 = vmax.f32 %v1075_v53, 0.0  ;;  %v982_v4 = vpack.c.bf16 %v957_v35, %v955_v44  ;;  %v960_v53 = vadd.f32 %v959_v30, %v3096_v63 }
 0x1bc   : > { %1116 = vmatmul.bf16.gmra.mxu2 %v980_v36  ;;  %v3123_v13 = vpack.c.bf16 %v1147_v31, %v1146_v39  ;;  %v961_v25 = vpop.f32.mrf.mxu3 }
 0x1bd   : > { %v962_v36 = vadd.f32 %v961_v25, %v3098_v9 }
 0x1bf   : > { %v1077_v48 = vpop.f32.mrf.mxu2 }
 0x1c0   : > { %v1078_v7 = vadd.f32 %v3107_v3, %v1077_v48  ;;  %v983_v48 = vpack.c.bf16 %v962_v36, %v960_v53 }
 0x1c2   : > { %v1148_v11 = vmax.f32 %v1078_v7, 0.0 }
 0x1c4   : > { %v964_v31 = vpop.f32.mrf.mxu3 }
 0x1c5   : > { %v965_v7 = vadd.f32 %v964_v31, %v3100_v24 }
 0x1c7   : > { %v1079_v17 = vpop.f32.mrf.mxu2 }
 0x1c8   : > { %v1080_v49 = vadd.f32 %v3107_v3, %v1079_v17 }
 0x1ca   : > { %v1149_v16 = vmax.f32 %v1080_v49, 0.0 }
 0x1cc   : > { %1121 = vmatmul.bf16.gmra.mxu2 %v981_v60  ;;  %v1177_v15 = vpack.c.bf16 %v1149_v16, %v1148_v11  ;;  %v966_v54 = vpop.f32.mrf.mxu3 }
 0x1cd   : > { %v967_v32 = vadd.f32 %v966_v54, %v3102_v41 }
 0x1cf   : > { %v1082_v29 = vpop.f32.mrf.mxu2  ;;  %v984_v61 = vpack.c.bf16 %v967_v32, %v965_v7 }
 0x1d0   : > { %v1083_v31 = vadd.f32 %v3107_v3, %v1082_v29 }
 0x1d2   : > { %v1150_v7 = vmax.f32 %v1083_v31, 0.0 }
 0x1d7   : > { %v1084_v12 = vpop.f32.mrf.mxu2 }
 0x1d8   : > { %v1085_v25 = vadd.f32 %v3107_v3, %v1084_v12 }
 0x1dc   : > { %1126 = vmatmul.bf16.gmra.mxu2 %v982_v4 }
 0x1df   : > { %v1087_v37 = vpop.f32.mrf.mxu2 }
 0x1e0   : > { %v1088_v41 = vadd.f32 %v3107_v3, %v1087_v37 }
 0x1e7   : > { %v1089_v39 = vpop.f32.mrf.mxu2 }
 0x1e8   : > { %v1090_v30 = vadd.f32 %v3107_v3, %v1089_v39 }
 0x1ea   : > { %v1153_v53 = vmax.f32 %v1090_v30, 0.0 }
 0x1ec   : > { %1131 = vmatmul.bf16.gmra.mxu2 %v983_v48  ;;  %v1152_v48 = vmax.f32 %v1088_v41, 0.0 }
 0x1ee   : > { %v1179_v54 = vpack.c.bf16 %v1153_v53, %v1152_v48 }
 0x1ef   : > { %v1092_v59 = vpop.f32.mrf.mxu2 }
 0x1f0   : > { %v1093_v8 = vadd.f32 %v3107_v3, %v1092_v59  ;;  %v1151_v59 = vmax.f32 %v1085_v25, 0.0 }
 0x1f2   : > { %v1154_v35 = vmax.f32 %v1093_v8, 0.0 }
 0x1f7   : > { %v1094_v51 = vpop.f32.mrf.mxu2 }
 0x1f8   : > { %v1095_v63 = vadd.f32 %v3107_v3, %v1094_v51  ;;  %v1178_v51 = vpack.c.bf16 %v1151_v59, %v1150_v7 }
 0x1fa   : > { %v1155_v24 = vmax.f32 %v1095_v63, 0.0 }
 0x1fc   : > { %1136 = vmatmul.bf16.gmra.mxu2 %v984_v61  ;;  %v1180_v36 = vpack.c.bf16 %v1155_v24, %v1154_v35 }
 0x1ff   : > { %v1097_v17 = vpop.f32.mrf.mxu2 }
 0x200   : > { %v1098_v49 = vadd.f32 %v3107_v3, %v1097_v17 }
 0x202   : > { %v1156_v11 = vmax.f32 %v1098_v49, 0.0 }
 0x207   : > { %v1099_v60 = vpop.f32.mrf.mxu2 }
 0x208   : > { %v1100_v9 = vadd.f32 %v3107_v3, %v1099_v60 }
 0x20a   : > { %v1157_v16 = vmax.f32 %v1100_v9, 0.0 }
 0x20c   : > { %v1181_v44 = vpack.c.bf16 %v1157_v16, %v1156_v11 }
 0x20e   : > { %1190 = vmatpush.bf16.msrb.mxu3 %v1181_v44 }
 0x20f   : > { %v1102_v4 = vpop.f32.mrf.mxu2 }
 0x210   : > { %v1103_v39 = vadd.f32 %v3107_v3, %v1102_v4 }
 0x212   : > { %1191 = vmatpush.bf16.msrb.mxu3 %v1180_v36  ;;  %v1158_v61 = vmax.f32 %v1103_v39, 0.0 }
 0x216   : > { %1192 = vmatpush.bf16.msrb.mxu3 %v1179_v54 }
 0x217   : > { %v1104_v32 = vpop.f32.mrf.mxu2 }
 0x218   : > { %v1105_v37 = vadd.f32 %v3107_v3, %v1104_v32 }
 0x21a   : > { %v1159_v17 = vmax.f32 %v1105_v37, 0.0  ;;  %1193 = vmatpush.bf16.msrb.mxu3 %v1178_v51 }
 0x21c   : > { %v3145_v12 = vpack.c.bf16 %v1159_v17, %v1158_v61 }
 0x21e   : > { %1194 = vmatpush.bf16.msrb.mxu3 %v1177_v15 }
 0x21f   : > { %v1107_v49 = vpop.f32.mrf.mxu2 }
 0x220   : > { %v1108_v29 = vadd.f32 %v3107_v3, %v1107_v49 }
 0x222   : > { %1195 = vmatpush.bf16.msrb.mxu3 %v3123_v13  ;;  %v1160_v9 = vmax.f32 %v1108_v29, 0.0 }
 0x226   : > { %1196 = vmatpush.bf16.msrb.mxu3 %v3117_v14 }
 0x227   : > { %v1109_v60 = vpop.f32.mrf.mxu2 }
 0x228   : > { %v1110_v63 = vadd.f32 %v3107_v3, %v1109_v60 }
 0x22a   : > { %v1161_v8 = vmax.f32 %v1110_v63, 0.0  ;;  %1197 = vmatpush.bf16.msrb.mxu3 %v3111_v47 }
 0x22c   : > { %v1183_v11 = vpack.c.bf16 %v1161_v8, %v1160_v9 }
 0x22d   : > { %1198 = vmatmul.bf16.vlgmr.msrb.gmra.mxu3 %v2924_v21 }
 0x22f   : > { %v1112_v16 = vpop.f32.mrf.mxu2 }
 0x230   : > { %v1113_v15 = vadd.f32 %v3107_v3, %v1112_v16 }
 0x232   : > { %v1162_v24 = vmax.f32 %v1113_v15, 0.0 }
 0x237   : > { %v1114_v30 = vpop.f32.mrf.mxu2 }
 0x238   : > { %v1115_v13 = vadd.f32 %v3107_v3, %v1114_v30 }
 0x23a   : > { %v1163_v44 = vmax.f32 %v1115_v13, 0.0 }
 0x23c   : > { %v1184_v41 = vpack.c.bf16 %v1163_v44, %v1162_v24 }
 0x23d   : > { %1203 = vmatmul.bf16.gmra.mxu3 %v2944_v33 }
 0x23f   : > { %v1117_v14 = vpop.f32.mrf.mxu2 }
 0x240   : > { %v1118_v35 = vadd.f32 %v3107_v3, %v1117_v14 }
 0x242   : > { %v1164_v25 = vmax.f32 %v1118_v35, 0.0 }
 0x247   : > { %v1119_v4 = vpop.f32.mrf.mxu2 }
 0x248   : > { %v1120_v47 = vadd.f32 %v3107_v3, %v1119_v4 }
 0x24a   : > { %v1165_v53 = vmax.f32 %v1120_v47, 0.0 }
 0x24c   : > { %v1185_v21 = vpack.c.bf16 %v1165_v53, %v1164_v25 }
 0x24d   : > { %1208 = vmatmul.bf16.gmra.mxu3 %v2964_v45 }
 0x24f   : > { %v1122_v36 = vpop.f32.mrf.mxu2 }
 0x250   : > { %v1123_v8 = vadd.f32 %v3107_v3, %v1122_v36 }
 0x252   : > { %v1166_v13 = vmax.f32 %v1123_v8, 0.0  ;;  %v3318_v8 = vld [vmem:[#allocation17_spill] sm:$0xff] }
 0x257   : > { %v1124_v31 = vpop.f32.mrf.mxu2 }
 0x258   : > { %v1125_v60 = vadd.f32 %v3107_v3, %v1124_v31 }
 0x25a   : > { %v1167_v15 = vmax.f32 %v1125_v60, 0.0 }
 0x25c   : > { %v1186_v24 = vpack.c.bf16 %v1167_v15, %v1166_v13 }
 0x25d   : > { %1213 = vmatmul.bf16.gmra.mxu3 %v2984_v57 }
 0x25f   : > { %v1127_v48 = vpop.f32.mrf.mxu2 }
 0x267   : > { %v1129_v59 = vpop.f32.mrf.mxu2 }
 0x268   : > { %v1130_v17 = vadd.f32 %v3107_v3, %v1129_v59 }
 0x26a   : > { %v1169_v63 = vmax.f32 %v1130_v17, 0.0 }
 0x26d   : > { %1218 = vmatmul.bf16.gmra.mxu3 %v3004_v5 }
 0x26f   : > { %v1132_v33 = vpop.f32.mrf.mxu2 }
 0x270   : > { %v1133_v51 = vadd.f32 %v3107_v3, %v1132_v33 }
 0x272   : > { %v1170_v29 = vmax.f32 %v1133_v51, 0.0 }
 0x277   : > { %v1134_v54 = vpop.f32.mrf.mxu2 }
 0x278   : > { %v1135_v37 = vadd.f32 %v3107_v3, %v1134_v54 }
 0x27a   : > { %v1171_v49 = vmax.f32 %v1135_v37, 0.0 }
 0x27c   : > { %v1188_v9 = vpack.c.bf16 %v1171_v49, %v1170_v29 }
 0x27d   : > { %1223 = vmatmul.bf16.gmra.mxu3 %v3024_v19  ;;  %v1128_v19 = vadd.f32 %v3107_v3, %v1127_v48 }
 0x27f   : > { %v1137_v7 = vpop.f32.mrf.mxu2  ;;  %v1168_v16 = vmax.f32 %v1128_v19, 0.0 }
 0x280   : > { %v1138_v39 = vadd.f32 %v3107_v3, %v1137_v7 }
 0x281   : > { %v1187_v30 = vpack.c.bf16 %v1169_v63, %v1168_v16 }
 0x282   : > { %v1172_v61 = vmax.f32 %v1138_v39, 0.0 }
 0x287   : > { %v1139_v32 = vpop.f32.mrf.mxu2 }
 0x288   : > { %v1140_v45 = vadd.f32 %v3107_v3, %v1139_v32 }
 0x28a   : > { %v1173_v57 = vmax.f32 %v1140_v45, 0.0 }
 0x28c   : > { %v1189_v5 = vpack.c.bf16 %v1173_v57, %v1172_v61 }
 0x28d   : > { %1228 = vmatmul.bf16.gmra.mxu3 %v3044_v42  ;;  %v2370_v42 = vld [vmem:[#allocation8 + $0x78] sm:$0xff] }
 0x28e   : > { %1279 = vmatpush.bf16.msrb.mxu0 %v1189_v5  ;;  %1454 = vmatpush.bf16.msrb.mxu1 %v2370_v42  ;;  %v3319_v42 = vld [vmem:[#allocation18_spill] sm:$0xff] }
 0x292   : > { %1280 = vmatpush.bf16.msrb.mxu0 %v1188_v9 }
 0x296   : > { %1281 = vmatpush.bf16.msrb.mxu0 %v1187_v30 }
 0x29a   : > { %1282 = vmatpush.bf16.msrb.mxu0 %v1186_v24 }
 0x29d   : > { %1233 = vmatmul.bf16.gmra.mxu3 %v3054_v55  ;;  %v2369_v55 = vld [vmem:[#allocation8 + $0x70] sm:$0xff] }
 0x29e   : > { %1283 = vmatpush.bf16.msrb.mxu0 %v1185_v21  ;;  %1455 = vmatpush.bf16.msrb.mxu1 %v2369_v55 }
 0x2a2   : > { %1284 = vmatpush.bf16.msrb.mxu0 %v1184_v41 }
 0x2a6   : > { %1285 = vmatpush.bf16.msrb.mxu0 %v1183_v11 }
 0x2aa   : > { %1286 = vmatpush.bf16.msrb.mxu0 %v3145_v12 }
 0x2ad   : > { %1287 = vmatmul.bf16.vlgmr.msrb.gmra.mxu0 %v2926_v22  ;;  %1238 = vmatmul.bf16.gmra.mxu3 %v3064_v1  ;;  %v2368_v22 = vld [vmem:[#allocation8 + $0x68] sm:$0xff]  ;;  %v2367_v1 = vld [vmem:[#allocation8 + $0x60] sm:$0xff] }
 0x2ae   : > { %1456 = vmatpush.bf16.msrb.mxu1 %v2368_v22 }
 0x2b2   : > { %1457 = vmatpush.bf16.msrb.mxu1 %v2367_v1 }
 0x2bd   : > { %1292 = vmatmul.bf16.gmra.mxu0 %v2946_v34  ;;  %1243 = vmatmul.bf16.gmra.mxu3 %v3074_v18  ;;  %v1199_v34 = vpop.f32.mrf.mxu3 }
 0x2c5   : > { %v1201_v18 = vpop.f32.mrf.mxu3 }
 0x2cd   : > { %1297 = vmatmul.bf16.gmra.mxu0 %v2966_v46  ;;  %1248 = vmatmul.bf16.gmra.mxu3 %v2933_v26  ;;  %v2366_v46 = vld [vmem:[#allocation8 + $0x58] sm:$0xff]  ;;  %v2365_v26 = vld [vmem:[#allocation8 + $0x50] sm:$0xff] }
 0x2ce   : > { %1458 = vmatpush.bf16.msrb.mxu1 %v2366_v46 }
 0x2d2   : > { %1459 = vmatpush.bf16.msrb.mxu1 %v2365_v26 }
 0x2dd   : > { %1302 = vmatmul.bf16.gmra.mxu0 %v2986_v58  ;;  %1253 = vmatmul.bf16.gmra.mxu3 %v2953_v38  ;;  %v2364_v38 = vld [vmem:[#allocation8 + $0x48] sm:$0xff]  ;;  %v1204_v58 = vpop.f32.mrf.mxu3 }
 0x2de   : > { %1460 = vmatpush.bf16.msrb.mxu1 %v2364_v38 }
 0x2ed   : > { %1307 = vmatmul.bf16.gmra.mxu0 %v3006_v6  ;;  %1258 = vmatmul.bf16.gmra.mxu3 %v2973_v50  ;;  %v2363_v6 = vld [vmem:[#allocation8 + $0x40] sm:$0xff] }
 0x2ee   : > { %1461 = vmatpush.bf16.msrb.mxu1 %v2363_v6 }
 0x2fd   : > { %1312 = vmatmul.bf16.gmra.mxu0 %v3026_v20  ;;  %v1206_v20 = vpop.f32.mrf.mxu3  ;;  %1263 = vmatmul.bf16.gmra.mxu3 %v2993_v62 }
 0x305   : > { %v1209_v3 = vpop.f32.mrf.mxu3 }
 0x30d   : > { %1317 = vmatmul.bf16.gmra.mxu0 %v3046_v43  ;;  %v1211_v12 = vpop.f32.mrf.mxu3  ;;  %1268 = vmatmul.bf16.gmra.mxu3 %v3013_v10 }
 0x315   : > { %v1214_v11 = vpop.f32.mrf.mxu3 }
 0x31d   : > { %1322 = vmatmul.bf16.gmra.mxu0 %v3056_v56  ;;  %v1216_v35 = vpop.f32.mrf.mxu3  ;;  %1273 = vmatmul.bf16.gmra.mxu3 %v3033_v27 }
 0x325   : > { %v1219_v62 = vpop.f32.mrf.mxu3 }
 0x32a   : > { %v1288_v50 = vpop.f32.mrf.mxu0 }
 0x32b   : > { %v1289_v43 = vadd.f32 %v1288_v50, %v1199_v34 }
 0x32d   : > { %1327 = vmatmul.bf16.gmra.mxu0 %v3066_v2  ;;  %v1221_v53 = vpop.f32.mrf.mxu3 }
 0x332   : > { %v1290_v44 = vpop.f32.mrf.mxu0 }
 0x333   : > { %v1291_v41 = vadd.f32 %v1290_v44, %v1201_v18 }
 0x335   : > { %v1368_v14 = vpack.c.bf16 %v1291_v41, %v1289_v43  ;;  %v1224_v21 = vpop.f32.mrf.mxu3 }
 0x337   : > { %1462 = vmatmul.bf16.vlgmr.msrb.gmra.mxu1 %v1368_v14 }
 0x33a   : > { %v1293_v4 = vpop.f32.mrf.mxu0 }
 0x33b   : > { %v1294_v47 = vadd.f32 %v1293_v4, %v1204_v58 }
 0x33d   : > { %1332 = vmatmul.bf16.gmra.mxu0 %v3076_v23  ;;  %v1226_v33 = vpop.f32.mrf.mxu3 }
 0x342   : > { %v1295_v56 = vpop.f32.mrf.mxu0 }
 0x343   : > { %v1296_v25 = vadd.f32 %v1295_v56, %v1206_v20 }
 0x345   : > { %v1369_v10 = vpack.c.bf16 %v1296_v25, %v1294_v47  ;;  %v1229_v39 = vpop.f32.mrf.mxu3 }
 0x347   : > { %1467 = vmatmul.bf16.gmra.mxu1 %v1369_v10 }
 0x34a   : > { %v1298_v2 = vpop.f32.mrf.mxu0 }
 0x34b   : > { %v1299_v31 = vadd.f32 %v1298_v2, %v1209_v3 }
 0x34d   : > { %1337 = vmatmul.bf16.gmra.mxu0 %v2936_v28  ;;  %v1231_v28 = vpop.f32.mrf.mxu3 }
 0x352   : > { %v1300_v36 = vpop.f32.mrf.mxu0 }
 0x353   : > { %v1301_v48 = vadd.f32 %v1300_v36, %v1211_v12  ;;  %v3200_v12 = vld [vmem:[%s3284_s4 + $0x1] ss:$0 sm:$0xff] }
 0x355   : > { %v1370_v59 = vpack.c.bf16 %v1301_v48, %v1299_v31  ;;  %v1234_v17 = vpop.f32.mrf.mxu3 }
 0x357   : > { %1472 = vmatmul.bf16.gmra.mxu1 %v1370_v59 }
 0x35a   : > { %v1303_v27 = vpop.f32.mrf.mxu0 }
 0x35b   : > { %v1304_v54 = vadd.f32 %v1303_v27, %v1214_v11 }
 0x35d   : > { %1342 = vmatmul.bf16.gmra.mxu0 %v2956_v40  ;;  %v1236_v5 = vpop.f32.mrf.mxu3 }
 0x362   : > { %v1305_v23 = vpop.f32.mrf.mxu0 }
 0x363   : > { %v1306_v7 = vadd.f32 %v1305_v23, %v1216_v35 }
 0x365   : > { %v1371_v32 = vpack.c.bf16 %v1306_v7, %v1304_v54  ;;  %v1239_v9 = vpop.f32.mrf.mxu3 }
 0x367   : > { %1477 = vmatmul.bf16.gmra.mxu1 %v1371_v32 }
 0x36a   : > { %v1308_v37 = vpop.f32.mrf.mxu0 }
 0x36b   : > { %v1309_v51 = vadd.f32 %v1308_v37, %v1219_v62 }
 0x36d   : > { %1347 = vmatmul.bf16.gmra.mxu0 %v2976_v52  ;;  %v1241_v13 = vpop.f32.mrf.mxu3 }
 0x372   : > { %v1310_v45 = vpop.f32.mrf.mxu0 }
 0x373   : > { %v1311_v61 = vadd.f32 %v1310_v45, %v1221_v53 }
 0x375   : > { %v1372_v57 = vpack.c.bf16 %v1311_v61, %v1309_v51 }
 0x377   : > { %1482 = vmatmul.bf16.gmra.mxu1 %v1372_v57 }
 0x37a   : > { %v1313_v49 = vpop.f32.mrf.mxu0 }
 0x37b   : > { %v1314_v19 = vadd.f32 %v1313_v49, %v1224_v21 }
 0x37d   : > { %1352 = vmatmul.bf16.gmra.mxu0 %v2996_v0  ;;  %v1244_v0 = vpop.f32.mrf.mxu3 }
 0x382   : > { %v1315_v40 = vpop.f32.mrf.mxu0 }
 0x383   : > { %v1316_v29 = vadd.f32 %v1315_v40, %v1226_v33 }
 0x385   : > { %v1373_v60 = vpack.c.bf16 %v1316_v29, %v1314_v19  ;;  %v1246_v18 = vpop.f32.mrf.mxu3 }
 0x387   : > { %1487 = vmatmul.bf16.gmra.mxu1 %v1373_v60 }
 0x38a   : > { %v1318_v63 = vpop.f32.mrf.mxu0 }
 0x38b   : > { %v1319_v16 = vadd.f32 %v1318_v63, %v1229_v39 }
 0x38d   : > { %1357 = vmatmul.bf16.gmra.mxu0 %v3318_v8  ;;  %v1249_v20 = vpop.f32.mrf.mxu3 }
 0x392   : > { %v1320_v52 = vpop.f32.mrf.mxu0 }
 0x393   : > { %v1321_v15 = vadd.f32 %v1320_v52, %v1231_v28 }
 0x395   : > { %v1374_v30 = vpack.c.bf16 %v1321_v15, %v1319_v16  ;;  %v1251_v41 = vpop.f32.mrf.mxu3 }
 0x397   : > { %1492 = vmatmul.bf16.gmra.mxu1 %v1374_v30 }
 0x39a   : > { %v1323_v24 = vpop.f32.mrf.mxu0 }
 0x39b   : > { %v1324_v22 = vadd.f32 %v1323_v24, %v1234_v17 }
 0x39d   : > { %1362 = vmatmul.bf16.gmra.mxu0 %v3319_v42  ;;  %v1254_v53 = vpop.f32.mrf.mxu3 }
 0x3a2   : > { %v1325_v55 = vpop.f32.mrf.mxu0 }
 0x3a3   : > { %v1326_v34 = vadd.f32 %v1325_v55, %v1236_v5 }
 0x3a5   : > { %v1375_v1 = vpack.c.bf16 %v1326_v34, %v1324_v22  ;;  %v1256_v23 = vpop.f32.mrf.mxu3 }
 0x3a7   : > { %1497 = vmatmul.bf16.gmra.mxu1 %v1375_v1 }
 0x3aa   : > { %v1328_v46 = vpop.f32.mrf.mxu0 }
 0x3ab   : > { %v1329_v38 = vadd.f32 %v1328_v46, %v1239_v9 }
 0x3ad   : > { %v1259_v51 = vpop.f32.mrf.mxu3 }
 0x3b2   : > { %v1330_v26 = vpop.f32.mrf.mxu0 }
 0x3b3   : > { %v1331_v58 = vadd.f32 %v1330_v26, %v1241_v13 }
 0x3b4   : > { %v1463_v6 = vpop.f32.mrf.mxu1 }
 0x3b5   : > { %v1376_v3 = vpack.c.bf16 %v1331_v58, %v1329_v38  ;;  %v1464_v11 = vadd.f32 %v3200_v12, %v1463_v6  ;;  %v1261_v63 = vpop.f32.mrf.mxu3 }
 0x3b7   : > { %1502 = vmatmul.bf16.gmra.mxu1 %v1376_v3  ;;  %v1543_v14 = vmax.f32 %v1464_v11, 0.0 }
 0x3ba   : > { %v1333_v50 = vpop.f32.mrf.mxu0 }
 0x3bb   : > { %v1334_v56 = vadd.f32 %v1333_v50, %v1244_v0 }
 0x3bc   : > { %v1465_v44 = vpop.f32.mrf.mxu1 }
 0x3bd   : > { %v1466_v43 = vadd.f32 %v3200_v12, %v1465_v44  ;;  %v1264_v13 = vpop.f32.mrf.mxu3 }
 0x3bf   : > { %v1544_v35 = vmax.f32 %v1466_v43, 0.0 }
 0x3c1   : > { %v3204_v4 = vpack.c.bf16 %v1544_v35, %v1543_v14 }
 0x3c2   : > { %v1335_v62 = vpop.f32.mrf.mxu0 }
 0x3c3   : > { %v1336_v47 = vadd.f32 %v1335_v62, %v1246_v18 }
 0x3c4   : > { %v1468_v25 = vpop.f32.mrf.mxu1 }
 0x3c5   : > { %v1377_v10 = vpack.c.bf16 %v1336_v47, %v1334_v56  ;;  %v1469_v21 = vadd.f32 %v3200_v12, %v1468_v25  ;;  %v1266_v1 = vpop.f32.mrf.mxu3 }
 0x3c7   : > { %1507 = vmatmul.bf16.gmra.mxu1 %v1377_v10  ;;  %v1545_v48 = vmax.f32 %v1469_v21, 0.0 }
 0x3ca   : > { %v1338_v2 = vpop.f32.mrf.mxu0 }
 0x3cb   : > { %v1339_v54 = vadd.f32 %v1338_v2, %v1249_v20 }
 0x3cc   : > { %v1470_v36 = vpop.f32.mrf.mxu1 }
 0x3cd   : > { %v1471_v31 = vadd.f32 %v3200_v12, %v1470_v36  ;;  %v1269_v6 = vpop.f32.mrf.mxu3 }
 0x3cf   : > { %v1546_v59 = vmax.f32 %v1471_v31, 0.0 }
 0x3d1   : > { %v3208_v27 = vpack.c.bf16 %v1546_v59, %v1545_v48 }
 0x3d2   : > { %v1340_v33 = vpop.f32.mrf.mxu0 }
 0x3d3   : > { %v1341_v7 = vadd.f32 %v1340_v33, %v1251_v41 }
 0x3d4   : > { %v1473_v39 = vpop.f32.mrf.mxu1 }
 0x3d5   : > { %v1378_v32 = vpack.c.bf16 %v1341_v7, %v1339_v54  ;;  %v1474_v28 = vadd.f32 %v3200_v12, %v1473_v39  ;;  %v1271_v44 = vpop.f32.mrf.mxu3 }
 0x3d7   : > { %1512 = vmatmul.bf16.gmra.mxu1 %v1378_v32  ;;  %v1547_v57 = vmax.f32 %v1474_v28, 0.0 }
 0x3da   : > { %v1343_v37 = vpop.f32.mrf.mxu0 }
 0x3db   : > { %v1344_v5 = vadd.f32 %v1343_v37, %v1254_v53 }
 0x3dc   : > { %v1475_v45 = vpop.f32.mrf.mxu1 }
 0x3dd   : > { %v1476_v61 = vadd.f32 %v3200_v12, %v1475_v45  ;;  %v1274_v56 = vpop.f32.mrf.mxu3 }
 0x3df   : > { %v1548_v17 = vmax.f32 %v1476_v61, 0.0 }
 0x3e1   : > { %v3212_v49 = vpack.c.bf16 %v1548_v17, %v1547_v57 }
 0x3e2   : > { %v1345_v40 = vpop.f32.mrf.mxu0 }
 0x3e3   : > { %v1346_v19 = vadd.f32 %v1345_v40, %v1256_v23 }
 0x3e4   : > { %v1478_v29 = vpop.f32.mrf.mxu1 }
 0x3e5   : > { %v1379_v60 = vpack.c.bf16 %v1346_v19, %v1344_v5  ;;  %v1479_v8 = vadd.f32 %v3200_v12, %v1478_v29  ;;  %v1276_v10 = vpop.f32.mrf.mxu3 }
 0x3e7   : > { %1517 = vmatmul.bf16.gmra.mxu1 %v1379_v60  ;;  %v1549_v15 = vmax.f32 %v1479_v8, 0.0 }
 0x3ea   : > { %v1348_v9 = vpop.f32.mrf.mxu0 }
 0x3eb   : > { %v1349_v0 = vadd.f32 %v1348_v9, %v1259_v51 }
 0x3ec   : > { %v1480_v52 = vpop.f32.mrf.mxu1 }
 0x3ed   : > { %v1481_v16 = vadd.f32 %v3200_v12, %v1480_v52 }
 0x3ef   : > { %v1550_v30 = vmax.f32 %v1481_v16, 0.0 }
 0x3f1   : > { %v3216_v24 = vpack.c.bf16 %v1550_v30, %v1549_v15 }
 0x3f2   : > { %v1350_v42 = vpop.f32.mrf.mxu0 }
 0x3f3   : > { %v1351_v55 = vadd.f32 %v1350_v42, %v1261_v63 }
 0x3f4   : > { %v1483_v22 = vpop.f32.mrf.mxu1 }
 0x3f5   : > { %v1380_v34 = vpack.c.bf16 %v1351_v55, %v1349_v0  ;;  %v1484_v5 = vadd.f32 %v3200_v12, %v1483_v22 }
 0x3f7   : > { %1522 = vmatmul.bf16.gmra.mxu1 %v1380_v34  ;;  %v1551_v63 = vmax.f32 %v1484_v5, 0.0 }
 0x3fa   : > { %v1353_v46 = vpop.f32.mrf.mxu0 }
 0x3fb   : > { %v1354_v38 = vadd.f32 %v1353_v46, %v1264_v13 }
 0x3fc   : > { %v1485_v18 = vpop.f32.mrf.mxu1 }
 0x3fd   : > { %v1486_v57 = vadd.f32 %v3200_v12, %v1485_v18 }
 0x3ff   : > { %v1552_v29 = vmax.f32 %v1486_v57, 0.0 }
 0x401   : > { %v1579_v52 = vpack.c.bf16 %v1552_v29, %v1551_v63 }
 0x402   : > { %v1355_v26 = vpop.f32.mrf.mxu0 }
 0x403   : > { %v1356_v58 = vadd.f32 %v1355_v26, %v1266_v1 }
 0x404   : > { %v1488_v20 = vpop.f32.mrf.mxu1 }
 0x405   : > { %v1381_v3 = vpack.c.bf16 %v1356_v58, %v1354_v38  ;;  %v1489_v45 = vadd.f32 %v3200_v12, %v1488_v20 }
 0x407   : > { %1527 = vmatmul.bf16.gmra.mxu1 %v1381_v3  ;;  %v1553_v19 = vmax.f32 %v1489_v45, 0.0 }
 0x40a   : > { %v1358_v50 = vpop.f32.mrf.mxu0 }
 0x40b   : > { %v1359_v41 = vadd.f32 %v1358_v50, %v1269_v6 }
 0x40c   : > { %v1490_v11 = vpop.f32.mrf.mxu1 }
 0x40d   : > { %v1491_v32 = vadd.f32 %v3200_v12, %v1490_v11 }
 0x40f   : > { %v1554_v17 = vmax.f32 %v1491_v32, 0.0 }
 0x411   : > { %v1580_v60 = vpack.c.bf16 %v1554_v17, %v1553_v19 }
 0x412   : > { %v1360_v43 = vpop.f32.mrf.mxu0 }
 0x413   : > { %v1361_v14 = vadd.f32 %v1360_v43, %v1271_v44 }
 0x414   : > { %v1493_v35 = vpop.f32.mrf.mxu1 }
 0x415   : > { %v1382_v62 = vpack.c.bf16 %v1361_v14, %v1359_v41  ;;  %v1494_v54 = vadd.f32 %v3200_v12, %v1493_v35 }
 0x417   : > { %1532 = vmatmul.bf16.gmra.mxu1 %v1382_v62  ;;  %v1555_v51 = vmax.f32 %v1494_v54, 0.0 }
 0x41a   : > { %v1363_v47 = vpop.f32.mrf.mxu0 }
 0x41b   : > { %v1364_v2 = vadd.f32 %v1363_v47, %v1274_v56 }
 0x41c   : > { %v1495_v25 = vpop.f32.mrf.mxu1 }
 0x41d   : > { %v1496_v33 = vadd.f32 %v3200_v12, %v1495_v25  ;;  %v2230_v25 = vld [vmem:[%s2898_s25] sm:$0xf] }
 0x41f   : > { %v1556_v37 = vmax.f32 %v1496_v33, 0.0 }
 0x421   : > { %v1581_v40 = vpack.c.bf16 %v1556_v37, %v1555_v51 }
 0x422   : > { %v1365_v53 = vpop.f32.mrf.mxu0 }
 0x423   : > { %v1366_v21 = vadd.f32 %v1365_v53, %v1276_v10  ;;  %v2372_v10 = vld [vmem:[%s2898_s25 + $0x4] sm:$0xf0] }
 0x424   : > { %v1498_v36 = vpop.f32.mrf.mxu1  ;;  %v2231_v53 = vor.u32 %v2372_v10, %v2230_v25 }
 0x425   : > { %v1383_v31 = vpack.c.bf16 %v1366_v21, %v1364_v2  ;;  %v1499_v48 = vadd.f32 %v3200_v12, %v1498_v36 }
 0x427   : > { %1537 = vmatmul.bf16.gmra.mxu1 %v1383_v31  ;;  %v1557_v7 = vmax.f32 %v1499_v48, 0.0 }
 0x42c   : > { %v1500_v59 = vpop.f32.mrf.mxu1 }
 0x42d   : > { %v1501_v23 = vadd.f32 %v3200_v12, %v1500_v59 }
 0x42f   : > { %v1558_v39 = vmax.f32 %v1501_v23, 0.0 }
 0x431   : > { %v1582_v28 = vpack.c.bf16 %v1558_v39, %v1557_v7  ;;  %v2380_v39 = vld [vmem:[#allocation8 + $0xb8] sm:$0xff] }
 0x433   : > { %1603 = vmatpush.bf16.msra.mxu2 %v1582_v28  ;;  %v2379_v28 = vld [vmem:[#allocation8 + $0xb0] sm:$0xff] }
 0x434   : > { %v1503_v61 = vpop.f32.mrf.mxu1 }
 0x435   : > { %v1504_v9 = vadd.f32 %v3200_v12, %v1503_v61 }
 0x437   : > { %1604 = vmatpush.bf16.msra.mxu2 %v1581_v40  ;;  %v1559_v15 = vmax.f32 %v1504_v9, 0.0  ;;  %v2378_v40 = vld [vmem:[#allocation8 + $0xa8] sm:$0xff]  ;;  %v2376_v9 = vld [vmem:[#allocation8 + $0x98] sm:$0xff] }
 0x43b   : > { %1605 = vmatpush.bf16.msra.mxu2 %v1580_v60  ;;  %v2377_v60 = vld [vmem:[#allocation8 + $0xa0] sm:$0xff] }
 0x43c   : > { %v1505_v8 = vpop.f32.mrf.mxu1 }
 0x43d   : > { %v1506_v16 = vadd.f32 %v3200_v12, %v1505_v8  ;;  %v2232_v8 = vld [vmem:[%s2898_s25 + $0x8] sm:$0xf0] }
 0x43f   : > { %v1560_v30 = vmax.f32 %v1506_v16, 0.0  ;;  %1606 = vmatpush.bf16.msra.mxu2 %v1579_v52  ;;  %v2375_v16 = vld [vmem:[#allocation8 + $0x90] sm:$0xff] }
 0x441   : > { %v3228_v13 = vpack.c.bf16 %v1560_v30, %v1559_v15  ;;  %v2374_v15 = vld [vmem:[#allocation8 + $0x88] sm:$0xff]  ;;  %v2373_v30 = vld [vmem:[#allocation8 + $0x80] sm:$0xff] }
 0x443   : > { %1607 = vmatpush.bf16.msra.mxu2 %v3216_v24 }
 0x444   : > { %v1508_v42 = vpop.f32.mrf.mxu1 }
 0x445   : > { %v1509_v0 = vadd.f32 %v3200_v12, %v1508_v42  ;;  %v2388_v42 = vld [vmem:[#allocation10 + $0x38] sm:$0xff] }
 0x447   : > { %1608 = vmatpush.bf16.msra.mxu2 %v3212_v49  ;;  %v1561_v34 = vmax.f32 %v1509_v0, 0.0  ;;  %v2387_v0 = vld [vmem:[#allocation10 + $0x30] sm:$0xff] }
 0x44b   : > { %1609 = vmatpush.bf16.msra.mxu2 %v3208_v27 }
 0x44c   : > { %v1510_v55 = vpop.f32.mrf.mxu1 }
 0x44d   : > { %v1511_v22 = vadd.f32 %v3200_v12, %v1510_v55  ;;  %v2386_v55 = vld [vmem:[#allocation10 + $0x28] sm:$0xff] }
 0x44f   : > { %v1562_v1 = vmax.f32 %v1511_v22, 0.0  ;;  %1610 = vmatpush.bf16.msra.mxu2 %v3204_v4  ;;  %v2385_v22 = vld [vmem:[#allocation10 + $0x20] sm:$0xff] }
 0x451   : > { %v1584_v46 = vpack.c.bf16 %v1562_v1, %v1561_v34  ;;  %v2384_v34 = vld [vmem:[#allocation10 + $0x18] sm:$0xff] }
 0x452   : > { %1611 = vmatmul.bf16.vlgmr.msra.gmra.mxu2 %v2231_v53  ;;  %v2484_v53 = vld [vmem:[#allocation2] ss:$0 sm:$0xff] }
 0x453   : > { %1702 = vmatpush.bf16.msrb.mxu2 %v2380_v39 }
 0x454   : > { %v1513_v18 = vpop.f32.mrf.mxu1 }
 0x455   : > { %v1514_v26 = vadd.f32 %v3200_v12, %v1513_v18 }
 0x457   : > { %v1563_v58 = vmax.f32 %v1514_v26, 0.0  ;;  %1703 = vmatpush.bf16.msrb.mxu2 %v2379_v28 }
 0x45b   : > { %1704 = vmatpush.bf16.msrb.mxu2 %v2378_v40 }
 0x45c   : > { %v1515_v38 = vpop.f32.mrf.mxu1 }
 0x45d   : > { %v1516_v24 = vadd.f32 %v3200_v12, %v1515_v38 }
 0x45f   : > { %v1564_v49 = vmax.f32 %v1516_v24, 0.0  ;;  %1705 = vmatpush.bf16.msrb.mxu2 %v2377_v60 }
 0x461   : > { %v1585_v6 = vpack.c.bf16 %v1564_v49, %v1563_v58  ;;  %v2383_v58 = vld [vmem:[#allocation10 + $0x10] sm:$0xff]  ;;  %v2382_v49 = vld [vmem:[#allocation10 + $0x8] sm:$0xff] }
 0x463   : > { %1706 = vmatpush.bf16.msrb.mxu2 %v2376_v9 }
 0x464   : > { %v1518_v27 = vpop.f32.mrf.mxu1 }
 0x465   : > { %v1519_v20 = vadd.f32 %v3200_v12, %v1518_v27 }
 0x467   : > { %v1565_v11 = vmax.f32 %v1519_v20, 0.0  ;;  %1707 = vmatpush.bf16.msrb.mxu2 %v2375_v16  ;;  %v2481_v20 = vld [vmem:[%s3284_s4 + $0x2] ss:$0 sm:$0xff] }
 0x46b   : > { %1708 = vmatpush.bf16.msrb.mxu2 %v2374_v15 }
 0x46c   : > { %v1520_v3 = vpop.f32.mrf.mxu1 }
 0x46d   : > { %v1521_v50 = vadd.f32 %v3200_v12, %v1520_v3 }
 0x46f   : > { %v1566_v4 = vmax.f32 %v1521_v50, 0.0  ;;  %1709 = vmatpush.bf16.msrb.mxu2 %v2373_v30 }
 0x471   : > { %v1586_v44 = vpack.c.bf16 %v1566_v4, %v1565_v11 }
 0x474   : > { %v1523_v43 = vpop.f32.mrf.mxu1 }
 0x475   : > { %v1524_v57 = vadd.f32 %v3200_v12, %v1523_v43 }
 0x477   : > { %v1567_v29 = vmax.f32 %v1524_v57, 0.0 }
 0x47c   : > { %v1525_v41 = vpop.f32.mrf.mxu1 }
 0x47d   : > { %v1526_v45 = vadd.f32 %v3200_v12, %v1525_v41 }
 0x47f   : > { %v1568_v5 = vmax.f32 %v1526_v45, 0.0 }
 0x481   : > { %v1587_v63 = vpack.c.bf16 %v1568_v5, %v1567_v29 }
 0x484   : > { %v1528_v14 = vpop.f32.mrf.mxu1 }
 0x485   : > { %v1529_v32 = vadd.f32 %v3200_v12, %v1528_v14  ;;  %v2483_v14 = vld [vmem:[%s3287_s7] ss:$0 sm:$0xff] }
 0x487   : > { %v1569_v17 = vmax.f32 %v1529_v32, 0.0 }
 0x48c   : > { %v1530_v35 = vpop.f32.mrf.mxu1 }
 0x48d   : > { %v1531_v23 = vadd.f32 %v3200_v12, %v1530_v35 }
 0x48f   : > { %v1570_v51 = vmax.f32 %v1531_v23, 0.0 }
 0x491   : > { %v1588_v19 = vpack.c.bf16 %v1570_v51, %v1569_v17 }
 0x494   : > { %v1533_v62 = vpop.f32.mrf.mxu1 }
 0x495   : > { %v1534_v48 = vadd.f32 %v3200_v12, %v1533_v62 }
 0x497   : > { %v1571_v37 = vmax.f32 %v1534_v48, 0.0 }
 0x49c   : > { %v1535_v56 = vpop.f32.mrf.mxu1 }
 0x49d   : > { %v1536_v36 = vadd.f32 %v3200_v12, %v1535_v56 }
 0x49f   : > { %v1572_v54 = vmax.f32 %v1536_v36, 0.0 }
 0x4a1   : > { %v1589_v61 = vpack.c.bf16 %v1572_v54, %v1571_v37 }
 0x4a4   : > { %v1538_v47 = vpop.f32.mrf.mxu1 }
 0x4a5   : > { %v1539_v2 = vadd.f32 %v3200_v12, %v1538_v47 }
 0x4a7   : > { %v1573_v59 = vmax.f32 %v1539_v2, 0.0 }
 0x4ac   : > { %v1540_v21 = vpop.f32.mrf.mxu1 }
 0x4ad   : > { %v1541_v31 = vadd.f32 %v3200_v12, %v1540_v21  ;;  %v2371_v12 = vld [vmem:[%s2898_s25 + $0x4] sm:$0xf] }
 0x4ae   : > { %v2235_v52 = vor.u32 %v2371_v12, %v2232_v8 }
 0x4af   : > { %v1574_v33 = vmax.f32 %v1541_v31, 0.0 }
 0x4b1   : > { %v1590_v7 = vpack.c.bf16 %v1574_v33, %v1573_v59 }
 0x4b3   : > { %1617 = vmatpush.bf16.msra.mxu3 %v1590_v7 }
 0x4b7   : > { %1618 = vmatpush.bf16.msra.mxu3 %v1589_v61 }
 0x4bb   : > { %1619 = vmatpush.bf16.msra.mxu3 %v1588_v19 }
 0x4bf   : > { %1620 = vmatpush.bf16.msra.mxu3 %v1587_v63 }
 0x4c3   : > { %1621 = vmatpush.bf16.msra.mxu3 %v1586_v44  ;;  %v2482_v44 = vld [vmem:[%s3286_s6] ss:$0 sm:$0xff] }
 0x4c7   : > { %1622 = vmatpush.bf16.msra.mxu3 %v1585_v6  ;;  %v2381_v6 = vld [vmem:[#allocation10] sm:$0xff] }
 0x4cb   : > { %1623 = vmatpush.bf16.msra.mxu3 %v1584_v46 }
 0x4cf   : > { %1624 = vmatpush.bf16.msra.mxu3 %v3228_v13 }
 0x4d2   : > { %1625 = vmatmul.bf16.vlgmr.msra.gmra.mxu3 %v2235_v52 }
 0x4d3   : > { %1785 = vmatpush.bf16.msrb.mxu3 %v2388_v42 }
 0x4d5   : > { %v1612_v1 = vpop.f32.mrf.mxu2 }
 0x4d7   : > { %1786 = vmatpush.bf16.msrb.mxu3 %v2387_v0 }
 0x4db   : > { %1787 = vmatpush.bf16.msrb.mxu3 %v2386_v55 }
 0x4dd   : > { %v1614_v13 = vpop.f32.mrf.mxu2 }
 0x4df   : > { %1788 = vmatpush.bf16.msrb.mxu3 %v2385_v22 }
 0x4e3   : > { %1789 = vmatpush.bf16.msrb.mxu3 %v2384_v34 }
 0x4e7   : > { %1790 = vmatpush.bf16.msrb.mxu3 %v2383_v58 }
 0x4eb   : > { %1791 = vmatpush.bf16.msrb.mxu3 %v2382_v49 }
 0x4ef   : > { %1792 = vmatpush.bf16.msrb.mxu3 %v2381_v6 }
 0x555   : > { %v1626_v46 = vpop.f32.mrf.mxu3 }
 0x556   : > { %v1627_v26 = vadd.f32 %v1626_v46, %v1612_v1 }
 0x55d   : > { %v1628_v18 = vpop.f32.mrf.mxu3 }
 0x55e   : > { %v1629_v38 = vadd.f32 %v1628_v18, %v1614_v13 }
 0x560   : > { %v1631_v24 = vpack.c.bf16 %v1629_v38, %v1627_v26 }
 0x562   : > { %1710 = vmatmul.bf16.vlgmr.msrb.gmra.mxu2 %v1631_v24 }
 0x5e5   : > { %v1711_v27 = vpop.f32.mrf.mxu2 }
 0x5e6   : > { %v1712_v50 = vadd.f32 %v2481_v20, %v1711_v27 }
 0x5ed   : > { %v1713_v3 = vpop.f32.mrf.mxu2 }
 0x5ee   : > { %v1714_v11 = vadd.f32 %v2481_v20, %v1713_v3 }
 0x5f0   : > { %v1716_v4 = vpack.c.bf16 %v1714_v11, %v1712_v50 }
 0x5f2   : > { %1793 = vmatmul.bf16.vlgmr.msrb.gmra.mxu3 %v1716_v4 }
 0x675   : > { %v1794_v43 = vpop.f32.mrf.mxu3 }
 0x676   : > { %v1795_v41 = vadd.f32 %v2482_v44, %v1794_v43 }
 0x678   : > { %v1799_v35 = vmax.f32 %v1795_v41, 0.0 }
 0x67a   : > { %v1805_v62 = vmul.f32 %v2483_v14, %v1799_v35 }
 0x67c   : > { %1807 = vadd.xlane.f32.xlu0 %v1805_v62 }
 0x67d   : > { %v1796_v56 = vpop.f32.mrf.mxu3 }
 0x67e   : > { %v1797_v47 = vadd.f32 %v2482_v44, %v1796_v56 }
 0x680   : > { %v1800_v25 = vmax.f32 %v1797_v47, 0.0 }
 0x682   : > { %v1806_v10 = vmul.f32 %v2483_v14, %v1800_v25 }
 0x684   : > { %1809 = vadd.xlane.f32.xlu0 %v1806_v10 }
 0x6ef   : > { %v1808_v2 = vpop.xlane.xlu0 %1807 }
 0x6f0   : > { %v1815_v21 = vadd.f32 %v2484_v53, %v1808_v2 }
 0x6f2   : > { %1818 = vst.msk [vmem:[%s470_s23] sm:$0xff] %vm1817_vm0, %v1815_v21 }
 0x6f7   : > { %v1810_v36 = vpop.xlane.xlu0 %1809 }
 0x6f8   : > { %v1816_v31 = vadd.f32 %v2484_v53, %v1810_v36 }
 0x6fa   : > { %1819 = vst.msk [vmem:[%s470_s23 + $0x8] sm:$0xff] %vm1817_vm0, %v1816_v31 }
 0x6fb PF: > { %s3320_s14 = sld [smem:[#allocation15_spill]]  ;;  %s3323_s11 = smov %s2669_s12 }
 0x6fc   : > { %s3321_s30 = sld [smem:[#allocation14_spill]] }
 0x6fd   : > { %s3322_s13 = sld [smem:[#allocation16_spill]] }
 0x701   : > { %p25_p4 = scmp.ge.s32.totalorder %s3320_s14, 4  }
 0x702   : > { %s3324_s12 = smov %s3321_s30 }
 0x703   :  { %27 = sbr.rel (!%p25_p4) target bundleno = 9 (0x9), region = 132 }
 0x708   :  { %1841 = vsyncpa [#allocation4], 1 }
 0x709   :  { %1843 = vsyncpa [#allocation4 + $0x1], 1 }
 0x70a   :  { %1844 = vsyncpa [#allocation6], 1 }
 0x70b   :  { %1846 = vsyncpa [#allocation6 + $0x1], 1 }
 0x70c   :  { %1847 = vsyncpa [#allocation9], 1 }

</bundles_post_ra>
